<compile_context>
chip_gen: v7x
topology: tpu7x:2x2x1
jax: 0.10.0
libtpu: 0.0.40
codegen_flags: <defaults>
</compile_context>

<pallas_src>
import math

import jax
import jax.numpy as jnp
from jax.experimental import pallas as pl
from jax.experimental.pallas import tpu as pltpu


# ----------------------------------------------------------------------------
# In-kernel building blocks (operate on VMEM/SMEM refs and values only)
# ----------------------------------------------------------------------------
def _stable_sigmoid(z):
    """Numerically stable sigmoid: exp of a non-positive argument + reciprocal."""
    ez = jnp.exp(-jnp.abs(z))                       # in (0, 1], never overflows
    r = pl.reciprocal(1.0 + ez, approx=False)
    return jnp.where(z >= 0.0, r, ez * r)


def _im2col_conv_prelu(src_ref, n_rows, pitch, w_ref, b_ref, alpha, dst_ref):
    """3x3 valid conv (stride 1) + scalar-slope PReLU as ONE MXU matmul.

    src_ref : (R_in, Cin) flat activation; row index = h*pitch + w.
    w_ref   : (9*Cin, Cout) im2col-packed weights (bf16), b_ref: (1, Cout) f32.
    dst_ref : (n_rows, Cout) flat output with the SAME row pitch as the input.
              Rows whose w-coordinate >= valid output width hold junk values,
              but downstream layers only ever read valid (h, w) positions.
    The 9 taps are shifted contiguous row-slices; lane-concat builds the
    (n_rows, 9*Cin) LHS so the whole layer is a single dot + a single store.
    """
    taps = [src_ref[pl.ds(kh * pitch + kw, n_rows), :]
            for kh in range(3) for kw in range(3)]
    lhs = jnp.concatenate(taps, axis=-1)                         # (n_rows, 9*Cin)
    z = jnp.dot(lhs, w_ref[...], preferred_element_type=jnp.float32) + b_ref[...]
    z = jnp.where(z >= 0.0, z, alpha * z)                        # PReLU
    dst_ref[...] = z.astype(dst_ref.dtype)


def _maxpool2x2_flat(src_ref, h_out, w_out, pitch, dst_ref):
    """2x2 / stride-2 max pool (floor mode) on a flat (h*pitch + w, C) buffer.

    Column pairing uses stride-2 sublane loads -> pure VPU work (no MXU
    selector matmuls, no per-iteration iota constants).  Output is compact
    with pitch w_out.
    """
    for hp in range(h_out):
        top = 2 * hp * pitch
        bot = top + pitch
        m = jnp.maximum(
            jnp.maximum(src_ref[pl.ds(top, w_out, stride=2), :],
                        src_ref[pl.ds(top + 1, w_out, stride=2), :]),
            jnp.maximum(src_ref[pl.ds(bot, w_out, stride=2), :],
                        src_ref[pl.ds(bot + 1, w_out, stride=2), :]))
        dst_ref[pl.ds(hp * w_out, w_out), :] = m.astype(dst_ref.dtype)


def _make_pnet_kernel(W, Hp, Wp, R1, R2, R3):
    """Kernel closure over the static flat-layout row counts / pitches."""

    def kernel(x_ref, w1_ref, b1_ref, w2_ref, b2_ref, w3_ref, b3_ref,
               wh_ref, bh_ref, cmask_ref, alpha_ref,
               out_ref, a1_ref, p1_ref, a2_ref, a3_ref):
        # Trunk — every intermediate stays in VMEM scratch.
        _im2col_conv_prelu(x_ref, R1, W, w1_ref, b1_ref, alpha_ref[0], a1_ref)
        _maxpool2x2_flat(a1_ref, Hp, Wp, W, p1_ref)
        _im2col_conv_prelu(p1_ref, R2, Wp, w2_ref, b2_ref, alpha_ref[1], a2_ref)
        _im2col_conv_prelu(a2_ref, R3, Wp, w3_ref, b3_ref, alpha_ref[2], a3_ref)

        # Fused 1x1-conv heads: one (R3, 32) x (32, 1+4+10) matmul; sigmoid is
        # applied on channel 0 via a host-precomputed mask (hoisted constant).
        z = jnp.dot(a3_ref[...], wh_ref[...],
                    preferred_element_type=jnp.float32) + bh_ref[...]
        out_ref[...] = jnp.where(cmask_ref[...] > 0.5, _stable_sigmoid(z), z)

    return kernel


# ----------------------------------------------------------------------------
# Host-side wrapper (weight repacking is tiny, one-time XLA work)
# ----------------------------------------------------------------------------
def _full_block(shape):
    zeros = (0,) * len(shape)
    return pl.BlockSpec(shape, lambda n, _z=zeros: _z)


def _prep_conv_w(w):
    """PyTorch OIHW (Cout, Cin, 3, 3) -> (9*Cin, Cout) im2col weight in bf16."""
    cout, cin, k, _ = w.shape
    return (jnp.transpose(w, (2, 3, 1, 0))
            .reshape(k * k * cin, cout).astype(jnp.bfloat16))


def _padded_vmem_bytes(shape, dtype):
    """Lane/sublane-padded VMEM footprint of a 2-D buffer."""
    item = jnp.dtype(dtype).itemsize
    sub = 8 * max(1, 4 // item)                 # (8,128) f32 tile, (16,128) bf16
    rows = math.prod(shape[:-1]) if len(shape) > 1 else 1
    lanes = shape[-1]
    return pl.cdiv(rows, sub) * sub * pl.cdiv(lanes, 128) * 128 * item


@jax.jit
def pnet_forward(x_nchw, params):
    N, Cin, H, W = x_nchw.shape
    Ho1, Wo1 = H - 2, W - 2          # conv1 (3x3 valid)
    Hp, Wp = Ho1 // 2, Wo1 // 2      # MaxPool2d(2, 2), floor mode
    Ho2, Wo2 = Hp - 2, Wp - 2        # conv2
    Ho3, Wo3 = Ho2 - 2, Wo2 - 2      # conv3
    assert Ho3 >= 1 and Wo3 >= 1, "input spatial size too small for PNet"

    # Flat spatial layout: row index = h*pitch + w, channels on lanes.
    R1 = (Ho1 - 1) * W + Wo1         # conv1 rows (pitch W; w >= Wo1 are junk)
    R2 = (Ho2 - 1) * Wp + Wo2        # conv2 rows (pitch Wp)
    R3 = (Ho3 - 1) * Wp + Wo3        # conv3 / head rows (pitch Wp)

    x_flat = (jnp.transpose(x_nchw, (0, 2, 3, 1))
              .reshape(N, H * W, Cin).astype(jnp.bfloat16))
    # v7x megacore load balance: keep an even number of grid steps.
    if N % 2 == 1:
        x_flat = jnp.concatenate([x_flat, x_flat[-1:]], axis=0)
    Ng = x_flat.shape[0]

    w1 = _prep_conv_w(params["conv1_w"])
    w2 = _prep_conv_w(params["conv2_w"])
    w3 = _prep_conv_w(params["conv3_w"])
    b1 = params["conv1_b"].reshape(1, -1).astype(jnp.float32)
    b2 = params["conv2_b"].reshape(1, -1).astype(jnp.float32)
    b3 = params["conv3_b"].reshape(1, -1).astype(jnp.float32)
    # Heads stacked along the output-channel (lane) dim: [cls | bbox | landmarks].
    wh = jnp.concatenate([params["cls_w"].reshape(1, -1),
                          params["bbox_w"].reshape(4, -1),
                          params["lmk_w"].reshape(10, -1)],
                         axis=0).T.astype(jnp.bfloat16)                # (32, 15)
    bh = jnp.concatenate([params["cls_b"], params["bbox_b"],
                          params["lmk_b"]]).reshape(1, -1).astype(jnp.float32)
    n_out = wh.shape[-1]
    cmask = (jnp.arange(n_out) == 0).astype(jnp.float32).reshape(1, n_out)
    alphas = jnp.stack([params["prelu1"], params["prelu2"],
                        params["prelu3"]]).astype(jnp.float32)          # (3,) SMEM

    C1, C2, C3 = w1.shape[-1], w2.shape[-1], w3.shape[-1]

    # VMEM budget: scratch + double-buffered input/output blocks (+ headroom).
    scratch_bytes = (_padded_vmem_bytes((R1, C1), jnp.float32)
                     + _padded_vmem_bytes((Hp * Wp, C1), jnp.bfloat16)
                     + _padded_vmem_bytes((R2, C2), jnp.bfloat16)
                     + _padded_vmem_bytes((R3, C3), jnp.bfloat16))
    io_bytes = 2 * (_padded_vmem_bytes((H * W, Cin), jnp.bfloat16)
                    + _padded_vmem_bytes((R3, n_out), jnp.float32))
    vmem_limit = int(min(96 * 2 ** 20,
                         max(32 * 2 ** 20, 2 * (scratch_bytes + io_bytes))))

    out = pl.pallas_call(
        _make_pnet_kernel(W, Hp, Wp, R1, R2, R3),
        grid=(Ng,),
        in_specs=[
            pl.BlockSpec((None, H * W, Cin), lambda n: (n, 0, 0)),  # per-sample image
            _full_block(w1.shape), _full_block(b1.shape),
            _full_block(w2.shape), _full_block(b2.shape),
            _full_block(w3.shape), _full_block(b3.shape),
            _full_block(wh.shape), _full_block(bh.shape),
            _full_block(cmask.shape),                               # hoisted sigmoid mask
            pl.BlockSpec(memory_space=pltpu.MemorySpace.SMEM),      # PReLU slopes
        ],
        out_specs=pl.BlockSpec((None, R3, n_out), lambda n: (n, 0, 0)),
        out_shape=jax.ShapeDtypeStruct((Ng, R3, n_out), jnp.float32),
        scratch_shapes=[
            pltpu.VMEM((R1, C1), jnp.float32),       # conv1 out (f32: pool src)
            pltpu.VMEM((Hp * Wp, C1), jnp.bfloat16),  # pooled out (compact)
            pltpu.VMEM((R2, C2), jnp.bfloat16),       # conv2 out
            pltpu.VMEM((R3, C3), jnp.bfloat16),       # conv3 out
        ],
        compiler_params=pltpu.CompilerParams(
            dimension_semantics=("parallel",),        # megacore sharding on v7x
            vmem_limit_bytes=vmem_limit),
    )(x_flat, w1, b1, w2, b2, w3, b3, wh, bh, cmask, alphas)

    # Drop batch padding, expand the flat rows back to the (Ho3, Wo3) grid and
    # return PyTorch-style NCHW tensors (tiny XLA reshapes on a tiny tensor).
    out = out[:N]
    out = jnp.pad(out, ((0, 0), (0, Ho3 * Wp - R3), (0, 0)))
    out = out.reshape(N, Ho3, Wp, n_out)[:, :, :Wo3, :]
    cls = jnp.transpose(out[..., 0:1], (0, 3, 1, 2))
    bbox = jnp.transpose(out[..., 1:5], (0, 3, 1, 2))
    lmk = jnp.transpose(out[..., 5:15], (0, 3, 1, 2))
    return cls, bbox, lmk


# ----------------------------------------------------------------------------
# Deterministic synthetic parameters (nn.PReLU() default: scalar slope 0.25)
# ----------------------------------------------------------------------------
def init_params(key):
    ks = jax.random.split(key, 12)

    def w(k, shape, fan_in):
        return jax.random.normal(k, shape, jnp.float32) * (1.0 / jnp.sqrt(fan_in))

    return {
        "conv1_w": w(ks[0], (10, 3, 3, 3), 3 * 3 * 3),
        "conv1_b": w(ks[1], (10,), 3 * 3 * 3),
        "prelu1": jnp.asarray(0.25, jnp.float32),
        "conv2_w": w(ks[2], (16, 10, 3, 3), 10 * 3 * 3),
        "conv2_b": w(ks[3], (16,), 10 * 3 * 3),
        "prelu2": jnp.asarray(0.25, jnp.float32),
        "conv3_w": w(ks[4], (32, 16, 3, 3), 16 * 3 * 3),
        "conv3_b": w(ks[5], (32,), 16 * 3 * 3),
        "prelu3": jnp.asarray(0.25, jnp.float32),
        "cls_w": w(ks[6], (1, 32, 1, 1), 32),
        "cls_b": w(ks[7], (1,), 32),
        "bbox_w": w(ks[8], (4, 32, 1, 1), 32),
        "bbox_b": w(ks[9], (4,), 32),
        "lmk_w": w(ks[10], (10, 32, 1, 1), 32),
        "lmk_b": w(ks[11], (10,), 32),
    }


# Pure-JAX f32 reference (matches the PyTorch PNet forward) for correctness.
def _ref_forward(x, p):
    def conv(h, w, b):
        y = jax.lax.conv_general_dilated(
            h, w, window_strides=(1, 1), padding="VALID",
            dimension_numbers=("NCHW", "OIHW", "NCHW"))
        return y + b.reshape(1, -1, 1, 1)

    def prelu(h, a):
        return jnp.where(h >= 0, h, a * h)

    h = prelu(conv(x, p["conv1_w"], p["conv1_b"]), p["prelu1"])
    h = jax.lax.reduce_window(h, -jnp.inf, jax.lax.max,
                              (1, 1, 2, 2), (1, 1, 2, 2), "VALID")
    h = prelu(conv(h, p["conv2_w"], p["conv2_b"]), p["prelu2"])
    h = prelu(conv(h, p["conv3_w"], p["conv3_b"]), p["prelu3"])
    cls = jax.nn.sigmoid(conv(h, p["cls_w"], p["cls_b"]))
    bbox = conv(h, p["bbox_w"], p["bbox_b"])
    lmk = conv(h, p["lmk_w"], p["lmk_b"])
    return cls, bbox, lmk


if __name__ == "__main__":
    key = jax.random.PRNGKey(0)
    kx, kp = jax.random.split(key)
    x = jax.random.normal(kx, (2, 3, 16, 16), jnp.float32)   # N=2, C=3, 16x16
    params = init_params(kp)

    cls, bbox, lmk = pnet_forward(x, params)
    jax.block_until_ready((cls, bbox, lmk))

    # 16x16 -> conv1 14 -> pool 7 -> conv2 5 -> conv3 3 (heads keep 3x3).
    assert cls.shape == (2, 1, 3, 3)
    assert bbox.shape == (2, 4, 3, 3)
    assert lmk.shape == (2, 10, 3, 3)
    assert bool(jnp.all((cls >= 0.0) & (cls <= 1.0)))

    # Compare against the pure-JAX f32 reference.  Tolerance is sized to the
    # deliberate bf16 MXU-operand path (a tap-ordering / indexing bug would
    # show up as O(1) errors, far above this threshold).
    rcls, rbbox, rlmk = _ref_forward(x, params)
    assert bool(jnp.allclose(cls, rcls, atol=5e-2, rtol=5e-2)), "cls mismatch"
    assert bool(jnp.allclose(bbox, rbbox, atol=5e-2, rtol=5e-2)), "bbox mismatch"
    assert bool(jnp.allclose(lmk, rlmk, atol=5e-2, rtol=5e-2)), "lmk mismatch"

    print("KERNEL_OK")
</pallas_src>

<mosaic_0001>
module attributes {stable_mosaic.version = 11 : i64} {
  func.func @kernel(%arg0: i32, %arg1: memref<1x256x3xbf16, #tpu.memory_space<vmem>>, %arg2: memref<27x10xbf16, #tpu.memory_space<vmem>>, %arg3: memref<1x10xf32, #tpu.memory_space<vmem>>, %arg4: memref<90x16xbf16, #tpu.memory_space<vmem>>, %arg5: memref<1x16xf32, #tpu.memory_space<vmem>>, %arg6: memref<144x32xbf16, #tpu.memory_space<vmem>>, %arg7: memref<1x32xf32, #tpu.memory_space<vmem>>, %arg8: memref<32x15xbf16, #tpu.memory_space<vmem>>, %arg9: memref<1x15xf32, #tpu.memory_space<vmem>>, %arg10: memref<1x15xf32, #tpu.memory_space<vmem>>, %arg11: memref<3xf32, #tpu.memory_space<smem>>, %arg12: memref<1x17x15xf32, #tpu.memory_space<vmem>>, %arg13: memref<222x10xf32, #tpu.memory_space<vmem>>, %arg14: memref<49x10xbf16, #tpu.memory_space<vmem>>, %arg15: memref<33x16xbf16, #tpu.memory_space<vmem>>, %arg16: memref<17x32xbf16, #tpu.memory_space<vmem>>) attributes {dimension_semantics = [#tpu.dimension_semantics<parallel>], iteration_bounds = array<i64: 2>, scalar_prefetch = 0 : i64, scratch_operands = 4 : i64, tpu.core_type = #tpu.core_type<tc>, window_params = [{transform_indices = @transform_0, window_bounds = array<i64: 1, 256, 3>}, {pipeline_mode = #tpu.pipeline_mode<synchronous>, transform_indices = @transform_1, window_bounds = array<i64: 27, 10>}, {pipeline_mode = #tpu.pipeline_mode<synchronous>, transform_indices = @transform_2, window_bounds = array<i64: 1, 10>}, {pipeline_mode = #tpu.pipeline_mode<synchronous>, transform_indices = @transform_3, window_bounds = array<i64: 90, 16>}, {pipeline_mode = #tpu.pipeline_mode<synchronous>, transform_indices = @transform_4, window_bounds = array<i64: 1, 16>}, {pipeline_mode = #tpu.pipeline_mode<synchronous>, transform_indices = @transform_5, window_bounds = array<i64: 144, 32>}, {pipeline_mode = #tpu.pipeline_mode<synchronous>, transform_indices = @transform_6, window_bounds = array<i64: 1, 32>}, {pipeline_mode = #tpu.pipeline_mode<synchronous>, transform_indices = @transform_7, window_bounds = array<i64: 32, 15>}, {pipeline_mode = #tpu.pipeline_mode<synchronous>, transform_indices = @transform_8, window_bounds = array<i64: 1, 15>}, {pipeline_mode = #tpu.pipeline_mode<synchronous>, transform_indices = @transform_9, window_bounds = array<i64: 1, 15>}, {transform_indices = @transform_10, window_bounds = array<i64: 3>}, {transform_indices = @transform_11, window_bounds = array<i64: 1, 17, 15>}]} {
    %c0 = arith.constant 0 : index
    %0 = memref.load %arg11[%c0] : memref<3xf32, #tpu.memory_space<smem>>
    %c0_0 = arith.constant 0 : index
    %c0_1 = arith.constant 0 : index
    %c0_2 = arith.constant 0 : index
    %1 = vector.load %arg1[%c0_0, %c0_1, %c0_2] : memref<1x256x3xbf16, #tpu.memory_space<vmem>>, vector<1x222x3xbf16>
    %2 = vector.shape_cast %1 : vector<1x222x3xbf16> to vector<222x3xbf16>
    %c0_3 = arith.constant 0 : index
    %c1 = arith.constant 1 : index
    %c0_4 = arith.constant 0 : index
    %3 = vector.load %arg1[%c0_3, %c1, %c0_4] : memref<1x256x3xbf16, #tpu.memory_space<vmem>>, vector<1x222x3xbf16>
    %4 = vector.shape_cast %3 : vector<1x222x3xbf16> to vector<222x3xbf16>
    %c0_5 = arith.constant 0 : index
    %c2 = arith.constant 2 : index
    %c0_6 = arith.constant 0 : index
    %5 = vector.load %arg1[%c0_5, %c2, %c0_6] : memref<1x256x3xbf16, #tpu.memory_space<vmem>>, vector<1x222x3xbf16>
    %6 = vector.shape_cast %5 : vector<1x222x3xbf16> to vector<222x3xbf16>
    %c0_7 = arith.constant 0 : index
    %c16 = arith.constant 16 : index
    %c0_8 = arith.constant 0 : index
    %7 = vector.load %arg1[%c0_7, %c16, %c0_8] : memref<1x256x3xbf16, #tpu.memory_space<vmem>>, vector<1x222x3xbf16>
    %8 = vector.shape_cast %7 : vector<1x222x3xbf16> to vector<222x3xbf16>
    %c0_9 = arith.constant 0 : index
    %c17 = arith.constant 17 : index
    %c0_10 = arith.constant 0 : index
    %9 = vector.load %arg1[%c0_9, %c17, %c0_10] : memref<1x256x3xbf16, #tpu.memory_space<vmem>>, vector<1x222x3xbf16>
    %10 = vector.shape_cast %9 : vector<1x222x3xbf16> to vector<222x3xbf16>
    %c0_11 = arith.constant 0 : index
    %c18 = arith.constant 18 : index
    %c0_12 = arith.constant 0 : index
    %11 = vector.load %arg1[%c0_11, %c18, %c0_12] : memref<1x256x3xbf16, #tpu.memory_space<vmem>>, vector<1x222x3xbf16>
    %12 = vector.shape_cast %11 : vector<1x222x3xbf16> to vector<222x3xbf16>
    %c0_13 = arith.constant 0 : index
    %c32 = arith.constant 32 : index
    %c0_14 = arith.constant 0 : index
    %13 = vector.load %arg1[%c0_13, %c32, %c0_14] : memref<1x256x3xbf16, #tpu.memory_space<vmem>>, vector<1x222x3xbf16>
    %14 = vector.shape_cast %13 : vector<1x222x3xbf16> to vector<222x3xbf16>
    %c0_15 = arith.constant 0 : index
    %c33 = arith.constant 33 : index
    %c0_16 = arith.constant 0 : index
    %15 = vector.load %arg1[%c0_15, %c33, %c0_16] : memref<1x256x3xbf16, #tpu.memory_space<vmem>>, vector<1x222x3xbf16>
    %16 = vector.shape_cast %15 : vector<1x222x3xbf16> to vector<222x3xbf16>
    %c0_17 = arith.constant 0 : index
    %c34 = arith.constant 34 : index
    %c0_18 = arith.constant 0 : index
    %17 = vector.load %arg1[%c0_17, %c34, %c0_18] : memref<1x256x3xbf16, #tpu.memory_space<vmem>>, vector<1x222x3xbf16>
    %18 = vector.shape_cast %17 : vector<1x222x3xbf16> to vector<222x3xbf16>
    %19 = tpu.concatenate %2, %4, %6, %8, %10, %12, %14, %16, %18 in 1 : vector<222x3xbf16>, vector<222x3xbf16>, vector<222x3xbf16>, vector<222x3xbf16>, vector<222x3xbf16>, vector<222x3xbf16>, vector<222x3xbf16>, vector<222x3xbf16>, vector<222x3xbf16> -> vector<222x27xbf16>
    %c0_19 = arith.constant 0 : index
    %c0_20 = arith.constant 0 : index
    %20 = vector.load %arg2[%c0_19, %c0_20] : memref<27x10xbf16, #tpu.memory_space<vmem>>, vector<27x10xbf16>
    %cst = arith.constant dense<0.000000e+00> : vector<222x10xf32>
    %21 = tpu.matmul %19, %20, %cst {dimension_numbers = #tpu.dot_dimension_numbers<[1], [0], [0], [1], [0, 0, 1, 1], [], []>} : vector<222x27xbf16>, vector<27x10xbf16>, vector<222x10xf32> -> vector<222x10xf32>
    %c0_21 = arith.constant 0 : index
    %c0_22 = arith.constant 0 : index
    %22 = vector.load %arg3[%c0_21, %c0_22] : memref<1x10xf32, #tpu.memory_space<vmem>>, vector<1x10xf32>
    %23 = vector.broadcast %22 : vector<1x10xf32> to vector<222x10xf32>
    %24 = arith.addf %21, %23 : vector<222x10xf32>
    %cst_23 = arith.constant 0.000000e+00 : f32
    %25 = vector.broadcast %cst_23 : f32 to vector<222x10xf32>
    %26 = arith.cmpf oge, %24, %25 : vector<222x10xf32>
    %27 = vector.broadcast %0 : f32 to vector<222x10xf32>
    %28 = arith.mulf %27, %24 : vector<222x10xf32>
    %29 = arith.select %26, %24, %28 : vector<222x10xi1>, vector<222x10xf32>
    %c0_24 = arith.constant 0 : index
    %c0_25 = arith.constant 0 : index
    %30 = vector.load %arg13[%c0_24, %c0_25] : memref<222x10xf32, #tpu.memory_space<vmem>>, vector<222x10xf32>
    tpu.vector_store %arg13[%c0_24, %c0_25], %29 {strides = array<i32>} : memref<222x10xf32, #tpu.memory_space<vmem>>, vector<222x10xf32>,
    %c0_26 = arith.constant 0 : index
    %c0_27 = arith.constant 0 : index
    %31 = tpu.strided_load %arg13[%c0_26, %c0_27] {strides = array<i32: 2, 1>} : memref<222x10xf32, #tpu.memory_space<vmem>>, vector<7x10xf32>
    %c1_28 = arith.constant 1 : index
    %c0_29 = arith.constant 0 : index
    %32 = tpu.strided_load %arg13[%c1_28, %c0_29] {strides = array<i32: 2, 1>} : memref<222x10xf32, #tpu.memory_space<vmem>>, vector<7x10xf32>
    %33 = arith.maximumf %31, %32 : vector<7x10xf32>
    %c16_30 = arith.constant 16 : index
    %c0_31 = arith.constant 0 : index
    %34 = tpu.strided_load %arg13[%c16_30, %c0_31] {strides = array<i32: 2, 1>} : memref<222x10xf32, #tpu.memory_space<vmem>>, vector<7x10xf32>
    %c17_32 = arith.constant 17 : index
    %c0_33 = arith.constant 0 : index
    %35 = tpu.strided_load %arg13[%c17_32, %c0_33] {strides = array<i32: 2, 1>} : memref<222x10xf32, #tpu.memory_space<vmem>>, vector<7x10xf32>
    %36 = arith.maximumf %34, %35 : vector<7x10xf32>
    %37 = arith.maximumf %33, %36 : vector<7x10xf32>
    %38 = arith.truncf %37 : vector<7x10xf32> to vector<7x10xbf16>
    %c0_34 = arith.constant 0 : index
    %c0_35 = arith.constant 0 : index
    %39 = vector.load %arg14[%c0_34, %c0_35] : memref<49x10xbf16, #tpu.memory_space<vmem>>, vector<7x10xbf16>
    tpu.vector_store %arg14[%c0_34, %c0_35], %38 {strides = array<i32>} : memref<49x10xbf16, #tpu.memory_space<vmem>>, vector<7x10xbf16>,
    %c32_36 = arith.constant 32 : index
    %c0_37 = arith.constant 0 : index
    %40 = tpu.strided_load %arg13[%c32_36, %c0_37] {strides = array<i32: 2, 1>} : memref<222x10xf32, #tpu.memory_space<vmem>>, vector<7x10xf32>
    %c33_38 = arith.constant 33 : index
    %c0_39 = arith.constant 0 : index
    %41 = tpu.strided_load %arg13[%c33_38, %c0_39] {strides = array<i32: 2, 1>} : memref<222x10xf32, #tpu.memory_space<vmem>>, vector<7x10xf32>
    %42 = arith.maximumf %40, %41 : vector<7x10xf32>
    %c48 = arith.constant 48 : index
    %c0_40 = arith.constant 0 : index
    %43 = tpu.strided_load %arg13[%c48, %c0_40] {strides = array<i32: 2, 1>} : memref<222x10xf32, #tpu.memory_space<vmem>>, vector<7x10xf32>
    %c49 = arith.constant 49 : index
    %c0_41 = arith.constant 0 : index
    %44 = tpu.strided_load %arg13[%c49, %c0_41] {strides = array<i32: 2, 1>} : memref<222x10xf32, #tpu.memory_space<vmem>>, vector<7x10xf32>
    %45 = arith.maximumf %43, %44 : vector<7x10xf32>
    %46 = arith.maximumf %42, %45 : vector<7x10xf32>
    %47 = arith.truncf %46 : vector<7x10xf32> to vector<7x10xbf16>
    %c7 = arith.constant 7 : index
    %c0_42 = arith.constant 0 : index
    %48 = vector.load %arg14[%c7, %c0_42] : memref<49x10xbf16, #tpu.memory_space<vmem>>, vector<7x10xbf16>
    tpu.vector_store %arg14[%c7, %c0_42], %47 {strides = array<i32>} : memref<49x10xbf16, #tpu.memory_space<vmem>>, vector<7x10xbf16>,
    %c64 = arith.constant 64 : index
    %c0_43 = arith.constant 0 : index
    %49 = tpu.strided_load %arg13[%c64, %c0_43] {strides = array<i32: 2, 1>} : memref<222x10xf32, #tpu.memory_space<vmem>>, vector<7x10xf32>
    %c65 = arith.constant 65 : index
    %c0_44 = arith.constant 0 : index
    %50 = tpu.strided_load %arg13[%c65, %c0_44] {strides = array<i32: 2, 1>} : memref<222x10xf32, #tpu.memory_space<vmem>>, vector<7x10xf32>
    %51 = arith.maximumf %49, %50 : vector<7x10xf32>
    %c80 = arith.constant 80 : index
    %c0_45 = arith.constant 0 : index
    %52 = tpu.strided_load %arg13[%c80, %c0_45] {strides = array<i32: 2, 1>} : memref<222x10xf32, #tpu.memory_space<vmem>>, vector<7x10xf32>
    %c81 = arith.constant 81 : index
    %c0_46 = arith.constant 0 : index
    %53 = tpu.strided_load %arg13[%c81, %c0_46] {strides = array<i32: 2, 1>} : memref<222x10xf32, #tpu.memory_space<vmem>>, vector<7x10xf32>
    %54 = arith.maximumf %52, %53 : vector<7x10xf32>
    %55 = arith.maximumf %51, %54 : vector<7x10xf32>
    %56 = arith.truncf %55 : vector<7x10xf32> to vector<7x10xbf16>
    %c14 = arith.constant 14 : index
    %c0_47 = arith.constant 0 : index
    %57 = vector.load %arg14[%c14, %c0_47] : memref<49x10xbf16, #tpu.memory_space<vmem>>, vector<7x10xbf16>
    tpu.vector_store %arg14[%c14, %c0_47], %56 {strides = array<i32>} : memref<49x10xbf16, #tpu.memory_space<vmem>>, vector<7x10xbf16>,
    %c96 = arith.constant 96 : index
    %c0_48 = arith.constant 0 : index
    %58 = tpu.strided_load %arg13[%c96, %c0_48] {strides = array<i32: 2, 1>} : memref<222x10xf32, #tpu.memory_space<vmem>>, vector<7x10xf32>
    %c97 = arith.constant 97 : index
    %c0_49 = arith.constant 0 : index
    %59 = tpu.strided_load %arg13[%c97, %c0_49] {strides = array<i32: 2, 1>} : memref<222x10xf32, #tpu.memory_space<vmem>>, vector<7x10xf32>
    %60 = arith.maximumf %58, %59 : vector<7x10xf32>
    %c112 = arith.constant 112 : index
    %c0_50 = arith.constant 0 : index
    %61 = tpu.strided_load %arg13[%c112, %c0_50] {strides = array<i32: 2, 1>} : memref<222x10xf32, #tpu.memory_space<vmem>>, vector<7x10xf32>
    %c113 = arith.constant 113 : index
    %c0_51 = arith.constant 0 : index
    %62 = tpu.strided_load %arg13[%c113, %c0_51] {strides = array<i32: 2, 1>} : memref<222x10xf32, #tpu.memory_space<vmem>>, vector<7x10xf32>
    %63 = arith.maximumf %61, %62 : vector<7x10xf32>
    %64 = arith.maximumf %60, %63 : vector<7x10xf32>
    %65 = arith.truncf %64 : vector<7x10xf32> to vector<7x10xbf16>
    %c21 = arith.constant 21 : index
    %c0_52 = arith.constant 0 : index
    %66 = vector.load %arg14[%c21, %c0_52] : memref<49x10xbf16, #tpu.memory_space<vmem>>, vector<7x10xbf16>
    tpu.vector_store %arg14[%c21, %c0_52], %65 {strides = array<i32>} : memref<49x10xbf16, #tpu.memory_space<vmem>>, vector<7x10xbf16>,
    %c128 = arith.constant 128 : index
    %c0_53 = arith.constant 0 : index
    %67 = tpu.strided_load %arg13[%c128, %c0_53] {strides = array<i32: 2, 1>} : memref<222x10xf32, #tpu.memory_space<vmem>>, vector<7x10xf32>
    %c129 = arith.constant 129 : index
    %c0_54 = arith.constant 0 : index
    %68 = tpu.strided_load %arg13[%c129, %c0_54] {strides = array<i32: 2, 1>} : memref<222x10xf32, #tpu.memory_space<vmem>>, vector<7x10xf32>
    %69 = arith.maximumf %67, %68 : vector<7x10xf32>
    %c144 = arith.constant 144 : index
    %c0_55 = arith.constant 0 : index
    %70 = tpu.strided_load %arg13[%c144, %c0_55] {strides = array<i32: 2, 1>} : memref<222x10xf32, #tpu.memory_space<vmem>>, vector<7x10xf32>
    %c145 = arith.constant 145 : index
    %c0_56 = arith.constant 0 : index
    %71 = tpu.strided_load %arg13[%c145, %c0_56] {strides = array<i32: 2, 1>} : memref<222x10xf32, #tpu.memory_space<vmem>>, vector<7x10xf32>
    %72 = arith.maximumf %70, %71 : vector<7x10xf32>
    %73 = arith.maximumf %69, %72 : vector<7x10xf32>
    %74 = arith.truncf %73 : vector<7x10xf32> to vector<7x10xbf16>
    %c28 = arith.constant 28 : index
    %c0_57 = arith.constant 0 : index
    %75 = vector.load %arg14[%c28, %c0_57] : memref<49x10xbf16, #tpu.memory_space<vmem>>, vector<7x10xbf16>
    tpu.vector_store %arg14[%c28, %c0_57], %74 {strides = array<i32>} : memref<49x10xbf16, #tpu.memory_space<vmem>>, vector<7x10xbf16>,
    %c160 = arith.constant 160 : index
    %c0_58 = arith.constant 0 : index
    %76 = tpu.strided_load %arg13[%c160, %c0_58] {strides = array<i32: 2, 1>} : memref<222x10xf32, #tpu.memory_space<vmem>>, vector<7x10xf32>
    %c161 = arith.constant 161 : index
    %c0_59 = arith.constant 0 : index
    %77 = tpu.strided_load %arg13[%c161, %c0_59] {strides = array<i32: 2, 1>} : memref<222x10xf32, #tpu.memory_space<vmem>>, vector<7x10xf32>
    %78 = arith.maximumf %76, %77 : vector<7x10xf32>
    %c176 = arith.constant 176 : index
    %c0_60 = arith.constant 0 : index
    %79 = tpu.strided_load %arg13[%c176, %c0_60] {strides = array<i32: 2, 1>} : memref<222x10xf32, #tpu.memory_space<vmem>>, vector<7x10xf32>
    %c177 = arith.constant 177 : index
    %c0_61 = arith.constant 0 : index
    %80 = tpu.strided_load %arg13[%c177, %c0_61] {strides = array<i32: 2, 1>} : memref<222x10xf32, #tpu.memory_space<vmem>>, vector<7x10xf32>
    %81 = arith.maximumf %79, %80 : vector<7x10xf32>
    %82 = arith.maximumf %78, %81 : vector<7x10xf32>
    %83 = arith.truncf %82 : vector<7x10xf32> to vector<7x10xbf16>
    %c35 = arith.constant 35 : index
    %c0_62 = arith.constant 0 : index
    %84 = vector.load %arg14[%c35, %c0_62] : memref<49x10xbf16, #tpu.memory_space<vmem>>, vector<7x10xbf16>
    tpu.vector_store %arg14[%c35, %c0_62], %83 {strides = array<i32>} : memref<49x10xbf16, #tpu.memory_space<vmem>>, vector<7x10xbf16>,
    %c192 = arith.constant 192 : index
    %c0_63 = arith.constant 0 : index
    %85 = tpu.strided_load %arg13[%c192, %c0_63] {strides = array<i32: 2, 1>} : memref<222x10xf32, #tpu.memory_space<vmem>>, vector<7x10xf32>
    %c193 = arith.constant 193 : index
    %c0_64 = arith.constant 0 : index
    %86 = tpu.strided_load %arg13[%c193, %c0_64] {strides = array<i32: 2, 1>} : memref<222x10xf32, #tpu.memory_space<vmem>>, vector<7x10xf32>
    %87 = arith.maximumf %85, %86 : vector<7x10xf32>
    %c208 = arith.constant 208 : index
    %c0_65 = arith.constant 0 : index
    %88 = tpu.strided_load %arg13[%c208, %c0_65] {strides = array<i32: 2, 1>} : memref<222x10xf32, #tpu.memory_space<vmem>>, vector<7x10xf32>
    %c209 = arith.constant 209 : index
    %c0_66 = arith.constant 0 : index
    %89 = tpu.strided_load %arg13[%c209, %c0_66] {strides = array<i32: 2, 1>} : memref<222x10xf32, #tpu.memory_space<vmem>>, vector<7x10xf32>
    %90 = arith.maximumf %88, %89 : vector<7x10xf32>
    %91 = arith.maximumf %87, %90 : vector<7x10xf32>
    %92 = arith.truncf %91 : vector<7x10xf32> to vector<7x10xbf16>
    %c42 = arith.constant 42 : index
    %c0_67 = arith.constant 0 : index
    %93 = vector.load %arg14[%c42, %c0_67] : memref<49x10xbf16, #tpu.memory_space<vmem>>, vector<7x10xbf16>
    tpu.vector_store %arg14[%c42, %c0_67], %92 {strides = array<i32>} : memref<49x10xbf16, #tpu.memory_space<vmem>>, vector<7x10xbf16>,
    %c1_68 = arith.constant 1 : index
    %94 = memref.load %arg11[%c1_68] : memref<3xf32, #tpu.memory_space<smem>>
    %c0_69 = arith.constant 0 : index
    %c0_70 = arith.constant 0 : index
    %95 = vector.load %arg14[%c0_69, %c0_70] : memref<49x10xbf16, #tpu.memory_space<vmem>>, vector<33x10xbf16>
    %c1_71 = arith.constant 1 : index
    %c0_72 = arith.constant 0 : index
    %96 = vector.load %arg14[%c1_71, %c0_72] : memref<49x10xbf16, #tpu.memory_space<vmem>>, vector<33x10xbf16>
    %c2_73 = arith.constant 2 : index
    %c0_74 = arith.constant 0 : index
    %97 = vector.load %arg14[%c2_73, %c0_74] : memref<49x10xbf16, #tpu.memory_space<vmem>>, vector<33x10xbf16>
    %c7_75 = arith.constant 7 : index
    %c0_76 = arith.constant 0 : index
    %98 = vector.load %arg14[%c7_75, %c0_76] : memref<49x10xbf16, #tpu.memory_space<vmem>>, vector<33x10xbf16>
    %c8 = arith.constant 8 : index
    %c0_77 = arith.constant 0 : index
    %99 = vector.load %arg14[%c8, %c0_77] : memref<49x10xbf16, #tpu.memory_space<vmem>>, vector<33x10xbf16>
    %c9 = arith.constant 9 : index
    %c0_78 = arith.constant 0 : index
    %100 = vector.load %arg14[%c9, %c0_78] : memref<49x10xbf16, #tpu.memory_space<vmem>>, vector<33x10xbf16>
    %c14_79 = arith.constant 14 : index
    %c0_80 = arith.constant 0 : index
    %101 = vector.load %arg14[%c14_79, %c0_80] : memref<49x10xbf16, #tpu.memory_space<vmem>>, vector<33x10xbf16>
    %c15 = arith.constant 15 : index
    %c0_81 = arith.constant 0 : index
    %102 = vector.load %arg14[%c15, %c0_81] : memref<49x10xbf16, #tpu.memory_space<vmem>>, vector<33x10xbf16>
    %c16_82 = arith.constant 16 : index
    %c0_83 = arith.constant 0 : index
    %103 = vector.load %arg14[%c16_82, %c0_83] : memref<49x10xbf16, #tpu.memory_space<vmem>>, vector<33x10xbf16>
    %104 = tpu.concatenate %95, %96, %97, %98, %99, %100, %101, %102, %103 in 1 : vector<33x10xbf16>, vector<33x10xbf16>, vector<33x10xbf16>, vector<33x10xbf16>, vector<33x10xbf16>, vector<33x10xbf16>, vector<33x10xbf16>, vector<33x10xbf16>, vector<33x10xbf16> -> vector<33x90xbf16>
    %c0_84 = arith.constant 0 : index
    %c0_85 = arith.constant 0 : index
    %105 = vector.load %arg4[%c0_84, %c0_85] : memref<90x16xbf16, #tpu.memory_space<vmem>>, vector<90x16xbf16>
    %cst_86 = arith.constant dense<0.000000e+00> : vector<33x16xf32>
    %106 = tpu.matmul %104, %105, %cst_86 {dimension_numbers = #tpu.dot_dimension_numbers<[1], [0], [0], [1], [0, 0, 1, 1], [], []>} : vector<33x90xbf16>, vector<90x16xbf16>, vector<33x16xf32> -> vector<33x16xf32>
    %c0_87 = arith.constant 0 : index
    %c0_88 = arith.constant 0 : index
    %107 = vector.load %arg5[%c0_87, %c0_88] : memref<1x16xf32, #tpu.memory_space<vmem>>, vector<1x16xf32>
    %108 = vector.broadcast %107 : vector<1x16xf32> to vector<33x16xf32>
    %109 = arith.addf %106, %108 : vector<33x16xf32>
    %cst_89 = arith.constant 0.000000e+00 : f32
    %110 = vector.broadcast %cst_89 : f32 to vector<33x16xf32>
    %111 = arith.cmpf oge, %109, %110 : vector<33x16xf32>
    %112 = vector.broadcast %94 : f32 to vector<33x16xf32>
    %113 = arith.mulf %112, %109 : vector<33x16xf32>
    %114 = arith.select %111, %109, %113 : vector<33x16xi1>, vector<33x16xf32>
    %115 = arith.truncf %114 : vector<33x16xf32> to vector<33x16xbf16>
    %c0_90 = arith.constant 0 : index
    %c0_91 = arith.constant 0 : index
    %116 = vector.load %arg15[%c0_90, %c0_91] : memref<33x16xbf16, #tpu.memory_space<vmem>>, vector<33x16xbf16>
    tpu.vector_store %arg15[%c0_90, %c0_91], %115 {strides = array<i32>} : memref<33x16xbf16, #tpu.memory_space<vmem>>, vector<33x16xbf16>,
    %c2_92 = arith.constant 2 : index
    %117 = memref.load %arg11[%c2_92] : memref<3xf32, #tpu.memory_space<smem>>
    %c0_93 = arith.constant 0 : index
    %c0_94 = arith.constant 0 : index
    %118 = vector.load %arg15[%c0_93, %c0_94] : memref<33x16xbf16, #tpu.memory_space<vmem>>, vector<17x16xbf16>
    %c1_95 = arith.constant 1 : index
    %c0_96 = arith.constant 0 : index
    %119 = vector.load %arg15[%c1_95, %c0_96] : memref<33x16xbf16, #tpu.memory_space<vmem>>, vector<17x16xbf16>
    %c2_97 = arith.constant 2 : index
    %c0_98 = arith.constant 0 : index
    %120 = vector.load %arg15[%c2_97, %c0_98] : memref<33x16xbf16, #tpu.memory_space<vmem>>, vector<17x16xbf16>
    %c7_99 = arith.constant 7 : index
    %c0_100 = arith.constant 0 : index
    %121 = vector.load %arg15[%c7_99, %c0_100] : memref<33x16xbf16, #tpu.memory_space<vmem>>, vector<17x16xbf16>
    %c8_101 = arith.constant 8 : index
    %c0_102 = arith.constant 0 : index
    %122 = vector.load %arg15[%c8_101, %c0_102] : memref<33x16xbf16, #tpu.memory_space<vmem>>, vector<17x16xbf16>
    %c9_103 = arith.constant 9 : index
    %c0_104 = arith.constant 0 : index
    %123 = vector.load %arg15[%c9_103, %c0_104] : memref<33x16xbf16, #tpu.memory_space<vmem>>, vector<17x16xbf16>
    %c14_105 = arith.constant 14 : index
    %c0_106 = arith.constant 0 : index
    %124 = vector.load %arg15[%c14_105, %c0_106] : memref<33x16xbf16, #tpu.memory_space<vmem>>, vector<17x16xbf16>
    %c15_107 = arith.constant 15 : index
    %c0_108 = arith.constant 0 : index
    %125 = vector.load %arg15[%c15_107, %c0_108] : memref<33x16xbf16, #tpu.memory_space<vmem>>, vector<17x16xbf16>
    %c16_109 = arith.constant 16 : index
    %c0_110 = arith.constant 0 : index
    %126 = vector.load %arg15[%c16_109, %c0_110] : memref<33x16xbf16, #tpu.memory_space<vmem>>, vector<17x16xbf16>
    %127 = tpu.concatenate %118, %119, %120, %121, %122, %123, %124, %125, %126 in 1 : vector<17x16xbf16>, vector<17x16xbf16>, vector<17x16xbf16>, vector<17x16xbf16>, vector<17x16xbf16>, vector<17x16xbf16>, vector<17x16xbf16>, vector<17x16xbf16>, vector<17x16xbf16> -> vector<17x144xbf16>
    %c0_111 = arith.constant 0 : index
    %c0_112 = arith.constant 0 : index
    %128 = vector.load %arg6[%c0_111, %c0_112] : memref<144x32xbf16, #tpu.memory_space<vmem>>, vector<144x32xbf16>
    %cst_113 = arith.constant dense<0.000000e+00> : vector<17x32xf32>
    %129 = tpu.matmul %127, %128, %cst_113 {dimension_numbers = #tpu.dot_dimension_numbers<[1], [0], [0], [1], [0, 0, 1, 1], [], []>} : vector<17x144xbf16>, vector<144x32xbf16>, vector<17x32xf32> -> vector<17x32xf32>
    %c0_114 = arith.constant 0 : index
    %c0_115 = arith.constant 0 : index
    %130 = vector.load %arg7[%c0_114, %c0_115] : memref<1x32xf32, #tpu.memory_space<vmem>>, vector<1x32xf32>
    %131 = vector.broadcast %130 : vector<1x32xf32> to vector<17x32xf32>
    %132 = arith.addf %129, %131 : vector<17x32xf32>
    %cst_116 = arith.constant 0.000000e+00 : f32
    %133 = vector.broadcast %cst_116 : f32 to vector<17x32xf32>
    %134 = arith.cmpf oge, %132, %133 : vector<17x32xf32>
    %135 = vector.broadcast %117 : f32 to vector<17x32xf32>
    %136 = arith.mulf %135, %132 : vector<17x32xf32>
    %137 = arith.select %134, %132, %136 : vector<17x32xi1>, vector<17x32xf32>
    %138 = arith.truncf %137 : vector<17x32xf32> to vector<17x32xbf16>
    %c0_117 = arith.constant 0 : index
    %c0_118 = arith.constant 0 : index
    %139 = vector.load %arg16[%c0_117, %c0_118] : memref<17x32xbf16, #tpu.memory_space<vmem>>, vector<17x32xbf16>
    tpu.vector_store %arg16[%c0_117, %c0_118], %138 {strides = array<i32>} : memref<17x32xbf16, #tpu.memory_space<vmem>>, vector<17x32xbf16>,
    %c0_119 = arith.constant 0 : index
    %c0_120 = arith.constant 0 : index
    %140 = vector.load %arg16[%c0_119, %c0_120] : memref<17x32xbf16, #tpu.memory_space<vmem>>, vector<17x32xbf16>
    %c0_121 = arith.constant 0 : index
    %c0_122 = arith.constant 0 : index
    %141 = vector.load %arg8[%c0_121, %c0_122] : memref<32x15xbf16, #tpu.memory_space<vmem>>, vector<32x15xbf16>
    %cst_123 = arith.constant dense<0.000000e+00> : vector<17x15xf32>
    %142 = tpu.matmul %140, %141, %cst_123 {dimension_numbers = #tpu.dot_dimension_numbers<[1], [0], [0], [1], [0, 0, 1, 1], [], []>} : vector<17x32xbf16>, vector<32x15xbf16>, vector<17x15xf32> -> vector<17x15xf32>
    %c0_124 = arith.constant 0 : index
    %c0_125 = arith.constant 0 : index
    %143 = vector.load %arg9[%c0_124, %c0_125] : memref<1x15xf32, #tpu.memory_space<vmem>>, vector<1x15xf32>
    %144 = vector.broadcast %143 : vector<1x15xf32> to vector<17x15xf32>
    %145 = arith.addf %142, %144 : vector<17x15xf32>
    %c0_126 = arith.constant 0 : index
    %c0_127 = arith.constant 0 : index
    %146 = vector.load %arg10[%c0_126, %c0_127] : memref<1x15xf32, #tpu.memory_space<vmem>>, vector<1x15xf32>
    %cst_128 = arith.constant 5.000000e-01 : f32
    %147 = vector.broadcast %cst_128 : f32 to vector<1x15xf32>
    %148 = arith.cmpf ogt, %146, %147 : vector<1x15xf32>
    %149 = math.absf %145 : vector<17x15xf32>
    %cst_129 = arith.constant 0.000000e+00 : f32
    %150 = vector.broadcast %cst_129 : f32 to vector<17x15xf32>
    %151 = arith.subf %150, %149 : vector<17x15xf32>
    %152 = math.exp %151 : vector<17x15xf32>
    %cst_130 = arith.constant 1.000000e+00 : f32
    %153 = vector.broadcast %cst_130 : f32 to vector<17x15xf32>
    %154 = arith.addf %153, %152 : vector<17x15xf32>
    %155 = tpu.reciprocal %154 : vector<17x15xf32> -> vector<17x15xf32>
    %cst_131 = arith.constant 0.000000e+00 : f32
    %156 = vector.broadcast %cst_131 : f32 to vector<17x15xf32>
    %157 = arith.cmpf oge, %145, %156 : vector<17x15xf32>
    %158 = arith.mulf %152, %155 : vector<17x15xf32>
    %159 = arith.select %157, %155, %158 : vector<17x15xi1>, vector<17x15xf32>
    %160 = vector.shape_cast %148 : vector<1x15xi1> to vector<1x15xi1>
    %161 = vector.broadcast %160 : vector<1x15xi1> to vector<17x15xi1>
    %162 = arith.select %161, %159, %145 : vector<17x15xi1>, vector<17x15xf32>
    %c0_132 = arith.constant 0 : index
    %c0_133 = arith.constant 0 : index
    %c0_134 = arith.constant 0 : index
    %163 = vector.load %arg12[%c0_132, %c0_133, %c0_134] : memref<1x17x15xf32, #tpu.memory_space<vmem>>, vector<1x17x15xf32>
    %164 = vector.shape_cast %163 : vector<1x17x15xf32> to vector<17x15xf32>
    %165 = vector.shape_cast %162 : vector<17x15xf32> to vector<1x17x15xf32>
    tpu.vector_store %arg12[%c0_132, %c0_133, %c0_134], %165 {strides = array<i32>} : memref<1x17x15xf32, #tpu.memory_space<vmem>>, vector<1x17x15xf32>,
    return
  }
  func.func @transform_0(%arg0: i32) -> (i32, i32, i32) {
    %c0_i32 = arith.constant 0 : i32
    %c0_i32_0 = arith.constant 0 : i32
    %c0_i32_1 = arith.constant 0 : i32
    return %arg0, %c0_i32, %c0_i32_0 : i32, i32, i32
  }
  func.func @transform_1(%arg0: i32) -> (i32, i32) {
    %c0_i32 = arith.constant 0 : i32
    %c0_i32_0 = arith.constant 0 : i32
    %c0_i32_1 = arith.constant 0 : i32
    return %c0_i32, %c0_i32_0 : i32, i32
  }
  func.func @transform_2(%arg0: i32) -> (i32, i32) {
    %c0_i32 = arith.constant 0 : i32
    %c0_i32_0 = arith.constant 0 : i32
    %c0_i32_1 = arith.constant 0 : i32
    return %c0_i32, %c0_i32_0 : i32, i32
  }
  func.func @transform_3(%arg0: i32) -> (i32, i32) {
    %c0_i32 = arith.constant 0 : i32
    %c0_i32_0 = arith.constant 0 : i32
    %c0_i32_1 = arith.constant 0 : i32
    return %c0_i32, %c0_i32_0 : i32, i32
  }
  func.func @transform_4(%arg0: i32) -> (i32, i32) {
    %c0_i32 = arith.constant 0 : i32
    %c0_i32_0 = arith.constant 0 : i32
    %c0_i32_1 = arith.constant 0 : i32
    return %c0_i32, %c0_i32_0 : i32, i32
  }
  func.func @transform_5(%arg0: i32) -> (i32, i32) {
    %c0_i32 = arith.constant 0 : i32
    %c0_i32_0 = arith.constant 0 : i32
    %c0_i32_1 = arith.constant 0 : i32
    return %c0_i32, %c0_i32_0 : i32, i32
  }
  func.func @transform_6(%arg0: i32) -> (i32, i32) {
    %c0_i32 = arith.constant 0 : i32
    %c0_i32_0 = arith.constant 0 : i32
    %c0_i32_1 = arith.constant 0 : i32
    return %c0_i32, %c0_i32_0 : i32, i32
  }
  func.func @transform_7(%arg0: i32) -> (i32, i32) {
    %c0_i32 = arith.constant 0 : i32
    %c0_i32_0 = arith.constant 0 : i32
    %c0_i32_1 = arith.constant 0 : i32
    return %c0_i32, %c0_i32_0 : i32, i32
  }
  func.func @transform_8(%arg0: i32) -> (i32, i32) {
    %c0_i32 = arith.constant 0 : i32
    %c0_i32_0 = arith.constant 0 : i32
    %c0_i32_1 = arith.constant 0 : i32
    return %c0_i32, %c0_i32_0 : i32, i32
  }
  func.func @transform_9(%arg0: i32) -> (i32, i32) {
    %c0_i32 = arith.constant 0 : i32
    %c0_i32_0 = arith.constant 0 : i32
    %c0_i32_1 = arith.constant 0 : i32
    return %c0_i32, %c0_i32_0 : i32, i32
  }
  func.func @transform_10(%arg0: i32) -> i32 {
    %c0_i32 = arith.constant 0 : i32
    %c0_i32_0 = arith.constant 0 : i32
    return %c0_i32 : i32
  }
  func.func @transform_11(%arg0: i32) -> (i32, i32, i32) {
    %c0_i32 = arith.constant 0 : i32
    %c0_i32_0 = arith.constant 0 : i32
    %c0_i32_1 = arith.constant 0 : i32
    return %arg0, %c0_i32, %c0_i32_0 : i32, i32, i32
  }
}

</mosaic_0001>

<bundles_post_ra>
// kernel: pnet_forward.1
= control target key start
LH: loop header
LB: loop body
LE: loop exit
PB: predicated region body
PF: predicated region fallthrough
CT: control target
= control target key end

     0   :  { %16 = vsyncpa [#allocation7], 0  ;;  %s3104_s17 = smov 0   ;;  %s3965_s0 = inlined_call_operand.vmem [shape: bf16[2,256,3], index: 0, kind: input, shape index: {}]   ;;  %s3966_s1 = inlined_call_operand.vmem [shape: bf16[27,10], index: 1, kind: input, shape index: {}]   ;;  %s3967_s2 = inlined_call_operand.vmem [shape: f32[1,10], index: 2, kind: input, shape index: {}]   ;;  %s3968_s3 = inlined_call_operand.vmem [shape: bf16[90,16], index: 3, kind: input, shape index: {}]   ;;  %s3969_s4 = inlined_call_operand.vmem [shape: f32[1,16], index: 4, kind: input, shape index: {}]   ;;  %s3970_s5 = inlined_call_operand.vmem [shape: bf16[144,32], index: 5, kind: input, shape index: {}]   ;;  %s3971_s6 = inlined_call_operand.vmem [shape: f32[1,32], index: 6, kind: input, shape index: {}]   ;;  %s3972_s7 = inlined_call_operand.vmem [shape: bf16[32,15], index: 7, kind: input, shape index: {}]   ;;  %s3973_s8 = inlined_call_operand.vmem [shape: f32[1,15], index: 8, kind: input, shape index: {}]   ;;  %s3974_s9 = inlined_call_operand.vmem [shape: f32[1,15], index: 9, kind: input, shape index: {}]   ;;  %s3975_s10 = inlined_call_operand.vmem [shape: f32[3], index: 10, kind: input, shape index: {}]   ;;  %s3976_s11 = inlined_call_operand.vmem [shape: f32[2,17,15], index: 11, kind: output, shape index: {}]  }
   0x1 LB: > { %s2639_s18 = sadd.s32 4294967295, %s3015_s17   ;;  %p2641_p0 = scmp.ge.s32.totalorder %s3015_s17, 1  ;;  %s3015_s17 = sphi %s3104_s17, %s22_s17  }
   0x2   : > { %p289_p1 = scmp.lt.s32.totalorder %s3015_s17, 3  ;;  %s329_s21 = sshll.u32 %s3975_s10, 4  ;;  %s330_s21 = int_to_ptr.vmem [resolvable:$true] %s329_s21 }
   0x3   : > { %p2878_p3 = scmp.eq.s32.totalorder %s2639_s18, 0  ;;  %s2990_s23 = scalar_lea.vmem %s330_s21, 16 }
   0x4   : > { %p3115_p2 = pnand %p2641_p0, %p289_p1  ;;  %p2991_p6 = scmp.ne.s32.totalorder %s330_s21, %s2990_s23 }
   0x5   : > { %p2998_p10 = scmp.lt.s32.totalorder %s330_s21, %s330_s21  ;;  %p2999_p11 = scmp.lt.s32.totalorder %s2990_s23, %s2990_s23 }
   0x6   : > { %p2874_p4 = pneg %p3115_p2 }
   0x7   : > { %p3000_p12 = por %p2999_p11, %p2998_p10 }
   0x8   : > { %p2875_p5 = pnand %p2878_p3, %p2874_p4 }
   0xa   : > { %p2992_p7 = pneg %p2875_p5 }
   0xc   : > { %p2993_p8 = pnand %p2992_p7, %p2991_p6 }
   0xe   : > { %p2994_p9 = pneg %p2993_p8 }
  0x10   : > { %p3001_p13 = pnand %p3000_p12, %p2994_p9 }
  0x12   : > { %3004 = shalt.err (!%p3001_p13)
}
  0x13   : > { %s3017_s24 = smov [#allocation6]   ;;  %350 = sbr.rel (%p3115_p2) target bundleno = 1598 (0x63e), region = 64 }
  0x14   : > { %2877 = dma.vmem_to_smem (!%p2875_p5), %s330_s21, 16, %s3017_s24, [#allocation7]  }
  0x1a   : > { %3010 = dma.done.wait (%p2878_p3), [#allocation7], 16  }
  0x1b   : > { %3012 = vsyncadd (%p2878_p3), [#allocation7], 4294967280 }
  0x1c   : > { %356 = sfence }
  0x1d   : > { %p391_p0 = scmp.lt.s32.totalorder %s2639_s18, 1  ;;  %vm657_vm0 = vcmask 1046528   ;;  %s3018_s29 = smov 9   ;;  %vm514_vm1 = vsmask.f32 7424  ;;  %v2929_v40 = vld [vmem:[%s3966_s1] sm:$0xff]  }
  0x1e   : > { %s3019_s30 = smov 15   ;;  %s3020_s12 = smov 6   ;;  %2805 = vmatprep.subr.bf16.mxu0 %v2929_v40  ;;  %v2931_v48 = vld [vmem:[%s3966_s1 + $0x8] sm:$0x3f]   ;;  %vm1211_vm2 = vcmask 1044480   ;;  %vm1212_vm3 = vcmask 1045504  }
  0x1f   : > { %s3981_s18 = smov (!%p391_p0, %s2639_s18), 1  ;;  %s3021_s13 = smov 3   ;;  %2806 = vmatpush3.bf16.msra.mxu0 %v2929_v40  ;;  %v3024_v51 = vmov 65535   ;;  %vm927_vm4 = vcmask 23552   ;;  %vm957_vm5 = vcmask 48128   ;;  %vm986_vm6 = vcmask 72704  }
  0x20   : > { %s2761_s25 = sshll.u32 %s3981_s18, 7  ;;  %s3022_s16 = smov 12   ;;  %v1213_v52 = vsel %vm1211_vm2, 4294967295, %v3024_v51  ;;  %vm1015_vm7 = vcmask 97280   ;;  %vm1044_vm8 = vcmask 121856   ;;  %vm1073_vm9 = vcmask 146432  }
  0x21   : > { %s3132_s28 = scalar_lea.vmem %s3965_s0, %s2761_s25  ;;  %s3023_s19 = smov 18   ;;  %v1214_v53 = vsel %vm1212_vm3, %v1213_v52, 0  ;;  %vm1102_vm10 = vcmask 171008   ;;  %vm1131_vm11 = vcmask 195584   ;;  %vm1182_vm12 = vcmask 220160  }
  0x22   : > { %v407_v0 = vld [vmem:[%s3132_s28 + $0x10] sm:$0xf]  ;;  %v3136_v1 = vld [vmem:[%s3132_s28 + $0x14] sm:$0xf]  ;;  %v405_v2 = vld [vmem:[%s3132_s28 + $0x8] sm:$0xf]  ;;  %v1216_v54 = vand.u32 %v2931_v48, %v1214_v53 }
  0x23   : > { %v3140_v3 = vcombine.low %v407_v0, %v3136_v1  ;;  %v406_v4 = vld [vmem:[%s3132_s28 + $0xc] sm:$0xf]  ;;  %v436_v5 = vld [vmem:[%s3132_s28 + $0x8] sm:$0xe]  ;;  %v404_v6 = vld [vmem:[%s3132_s28 + $0x4] sm:$0xf] }
  0x24   : > { %v3145_v7 = vcombine.low %v405_v2, %v406_v4  ;;  %v2667_v8 = vcombine.low %v436_v5, %v406_v4  ;;  %v432_v9 = vld [vmem:[%s3132_s28] sm:$0xe]  ;;  %v3155_v14 = vld [vmem:[%s3132_s28 + $0x18] sm:$0xff]   ;;  %v440_v44 = vld [vmem:[%s3132_s28 + $0x10] sm:$0xe]  ;;  %s3025_s22 = smov 21   ;;  %2807 = vmatprep.subr.bf16.mxu0 %v1216_v54 }
  0x25   : > { %v403_v10 = vld [vmem:[%s3132_s28] sm:$0xf]  ;;  %720 = vrot.lane.b32.xlu1 %v3140_v3, %s3018_s29  ;;  %v661_v11 = vrot.slane %v3140_v3, 1  ;;  %v2664_v12 = vcombine.low %v432_v9, %v404_v6  ;;  %v531_v18 = vshll.u32 %v3140_v3, 16  ;;  %v663_v28 = vrot.slane %v3155_v14, 1  ;;  %v3207_v57 = vld [vmem:[%s3132_s28 + $0x28] sm:$0xff]   ;;  %2808 = vmatpush3.bf16.msra.mxu0 %v1216_v54 }
  0x26   : > { %v3152_v13 = vcombine.low %v403_v10, %v404_v6  ;;  %718 = vrot.lane.b32.xlu0 %v3145_v7, %s3018_s29  ;;  %v788_v15 = vrot.slane %v2667_v8, 1  ;;  %v659_v16 = vrot.slane %v3145_v7, 1  ;;  %v523_v17 = vshll.u32 %v3145_v7, 16  ;;  %v3179_v39 = vld [vmem:[%s3132_s28 + $0x20] sm:$0xff]   ;;  %s3026_s23 = smov 24   ;;  %v3318_v53 = vld [vmem:[%s3132_s28 + $0x58] sm:$0xff]  }
  0x27   : > { %v658_v19 = vrot.slane %v2664_v12, 1  ;;  %v527_v22 = vshrl.u32 %v3145_v7, 16  ;;  %v533_v29 = vrot.slane %v531_v18, 1  ;;  %v535_v32 = vshrl.u32 %v3140_v3, 16  ;;  %v3246_v12 = vld [vmem:[%s3132_s28 + $0x38] sm:$0xff]   ;;  %s402_s24 = sld [smem:[#allocation6]] }
  0x28   : > { %v516_v20 = vshrl.u32 %v3152_v13, 16  ;;  %v518_v21 = vshll.u32 %v3152_v13, 16  ;;  %v789_v23 = vsel %vm657_vm0, %v788_v15, %v661_v11  ;;  %v525_v26 = vrot.slane %v523_v17, 1  ;;  %s3027_s27 = smov 40   ;;  %s3031_s15 = smov 10  }
  0x29   : > { %v660_v24 = vsel %vm657_vm0, %v658_v19, %v659_v16  ;;  %v662_v27 = vsel %vm657_vm0, %v659_v16, %v661_v11  ;;  %v539_v33 = vshll.u32 %v3155_v14, 16  ;;  %v664_v35 = vsel %vm657_vm0, %v661_v11, %v663_v28  ;;  %s3032_s20 = smov 30   ;;  %s3040_s21 = smov 16  }
  0x2a   : > { %v520_v25 = vrot.slane %v518_v21, 1  ;;  %792 = vrot.lane.b32.xlu0 %v789_v23, %s3019_s30  ;;  %685 = vrot.lane.b32.xlu1 %v660_v24, %s3020_s12  ;;  %v529_v31 = vor.u32 %v527_v22, %v525_v26  ;;  %v537_v37 = vor.u32 %v535_v32, %v533_v29  ;;  %v543_v42 = vshrl.u32 %v3155_v14, 16  ;;  %v3261_v21 = vld [vmem:[%s3132_s28 + $0x40] sm:$0xff]  }
  0x2b   : > { %v541_v38 = vrot.slane %v539_v33, 1  ;;  %v547_v43 = vshll.u32 %v3179_v39, 16  ;;  %v2670_v47 = vcombine.low %v440_v44, %v3136_v1  ;;  %v665_v56 = vrot.slane %v3179_v39, 1  ;;  %v3225_v1 = vld [vmem:[%s3132_s28 + $0x30] sm:$0xff]  }
  0x2c   : > { %v521_v30 = vor.u32 %v520_v25, %v516_v20  ;;  %v534_v36 = vsel %vm514_vm1, %v529_v31, %v533_v29  ;;  %v551_v59 = vshrl.u32 %v3179_v39, 16  ;;  %v555_v60 = vshll.u32 %v3207_v57, 16 }
  0x2d   : > { %v542_v41 = vsel %vm514_vm1, %v537_v37, %v541_v38  ;;  %v545_v45 = vor.u32 %v543_v42, %v541_v38  ;;  %v549_v46 = vrot.slane %v547_v43, 1  ;;  %v895_v50 = vrot.slane %v2670_v47, 1  ;;  %v3297_v37 = vld [vmem:[%s3132_s28 + $0x50] sm:$0xff]  }
  0x2e   : > { %v526_v34 = vsel %vm514_vm1, %v521_v30, %v525_v26  ;;  %687 = vrot.lane.b32.xlu1 %v662_v27, %s3020_s12  ;;  %v666_v58 = vsel %vm657_vm0, %v663_v28, %v665_v56  ;;  %v557_v62 = vrot.slane %v555_v60, 1  ;;  %v667_v0 = vrot.slane %v3207_v57, 1  ;;  %v3282_v30 = vld [vmem:[%s3132_s28 + $0x48] sm:$0xff]  }
  0x2f   : > { %626 = vrot.lane.b32.xlu0 %v526_v34, %s3021_s13  ;;  %v550_v49 = vsel %vm514_vm1, %v545_v45, %v549_v46  ;;  %v896_v55 = vsel %vm657_vm0, %v895_v50, %v663_v28  ;;  %v553_v61 = vor.u32 %v551_v59, %v549_v46  ;;  %v559_v4 = vshrl.u32 %v3207_v57, 16 }
  0x30   : > { %v668_v2 = vsel %vm657_vm0, %v665_v56, %v667_v0  ;;  %v563_v5 = vshll.u32 %v3225_v1, 16  ;;  %v669_v10 = vrot.slane %v3225_v1, 1  ;;  %v567_v15 = vshrl.u32 %v3225_v1, 16 }
  0x31   : > { %v558_v63 = vsel %vm514_vm1, %v553_v61, %v557_v62  ;;  %v561_v6 = vor.u32 %v559_v4, %v557_v62  ;;  %v571_v16 = vshll.u32 %v3246_v12, 16  ;;  %v671_v20 = vrot.slane %v3246_v12, 1 }
  0x32   : > { %794 = vrot.lane.b32.xlu1 %v664_v35, %s3019_s30  ;;  %v565_v8 = vrot.slane %v563_v5, 1  ;;  %v670_v11 = vsel %vm657_vm0, %v667_v0, %v669_v10  ;;  %v575_v23 = vshrl.u32 %v3246_v12, 16  ;;  %v579_v24 = vshll.u32 %v3261_v21, 16 }
  0x33   : > { %628 = vrot.lane.b32.xlu0 %v534_v36, %s3021_s13  ;;  %v573_v18 = vrot.slane %v571_v16, 1  ;;  %v672_v22 = vsel %vm657_vm0, %v669_v10, %v671_v20  ;;  %v673_v28 = vrot.slane %v3261_v21, 1  ;;  %v583_v31 = vshrl.u32 %v3261_v21, 16  ;;  %v3341_v10 = vld [vmem:[%s3132_s28 + $0x60] sm:$0xff]  }
  0x34   : > { %v566_v9 = vsel %vm514_vm1, %v561_v6, %v565_v8  ;;  %v569_v17 = vor.u32 %v567_v15, %v565_v8  ;;  %v581_v26 = vrot.slane %v579_v24, 1  ;;  %v587_v32 = vshll.u32 %v3282_v30, 16 }
  0x35   : > { %v577_v25 = vor.u32 %v575_v23, %v573_v18  ;;  %v674_v29 = vsel %vm657_vm0, %v671_v20, %v673_v28  ;;  %v591_v40 = vshrl.u32 %v3282_v30, 16  ;;  %v599_v56 = vshrl.u32 %v3297_v37, 16 }
  0x36   : > { %759 = vrot.lane.b32.xlu1 %v542_v41, %s3022_s16  ;;  %v574_v19 = vsel %vm514_vm1, %v569_v17, %v573_v18  ;;  %v585_v33 = vor.u32 %v583_v31, %v581_v26  ;;  %v589_v34 = vrot.slane %v587_v32, 1  ;;  %v611_v23 = vshll.u32 %v3341_v10, 16 }
  0x37   : > { %757 = vrot.lane.b32.xlu0 %v534_v36, %s3022_s16  ;;  %v582_v27 = vsel %vm514_vm1, %v577_v25, %v581_v26  ;;  %v675_v36 = vrot.slane %v3282_v30, 1  ;;  %vm1448_vm14 = vcmask 80896  }
  0x38   : > { %v593_v43 = vor.u32 %v591_v40, %v589_v34  ;;  %v613_v32 = vrot.slane %v611_v23, 1 }
  0x39   : > { %v676_v38 = vsel %vm657_vm0, %v673_v28, %v675_v36 }
  0x3a   : > { %827 = vrot.lane.b32.xlu1 %v3155_v14, %s3023_s19 }
  0x3b   : > { %825 = vrot.lane.b32.xlu0 %v3140_v3, %s3023_s19 }
  0x3e   : > { %866 = vrot.lane.b32.xlu1 %v550_v49, %s3025_s22 }
  0x3f   : > { %864 = vrot.lane.b32.xlu0 %v542_v41, %s3025_s22 }
  0x42   : > { %630 = vrot.lane.b32.xlu1 %v542_v41, %s3021_s13  ;;  %v595_v41 = vshll.u32 %v3297_v37, 16 }
  0x43   : > { %899 = vrot.lane.b32.xlu0 %v896_v55, %s3026_s23 }
  0x44   : > { %v597_v44 = vrot.slane %v595_v41, 1 }
  0x46   : > { %632 = vrot.lane.b32.xlu1 %v550_v49, %s3021_s13  ;;  %v598_v46 = vsel %vm514_vm1, %v593_v43, %v597_v44  ;;  %v601_v0 = vor.u32 %v599_v56, %v597_v44 }
  0x47   : > { %901 = vrot.lane.b32.xlu0 %v666_v58, %s3026_s23 }
  0x4a   : > { %691 = vrot.lane.b32.xlu1 %v666_v58, %s3020_s12 }
  0x4b   : > { %689 = vrot.lane.b32.xlu0 %v664_v35, %s3020_s12  ;;  %v590_v35 = vsel %vm514_vm1, %v585_v33, %v589_v34 }
  0x4e   : > { %724 = vrot.lane.b32.xlu1 %v3179_v39, %s3018_s29 }
  0x4f   : > { %722 = vrot.lane.b32.xlu0 %v3155_v14, %s3018_s29 }
  0x52   : > { %763 = vrot.lane.b32.xlu1 %v558_v63, %s3022_s16 }
  0x53   : > { %761 = vrot.lane.b32.xlu0 %v550_v49, %s3022_s16  ;;  %v677_v49 = vrot.slane %v3297_v37, 1 }
  0x55   : > { %v678_v52 = vsel %vm657_vm0, %v675_v36, %v677_v49 }
  0x56   : > { %798 = vrot.lane.b32.xlu1 %v668_v2, %s3019_s30 }
  0x57   : > { %796 = vrot.lane.b32.xlu0 %v666_v58, %s3019_s30  ;;  %v603_v58 = vshll.u32 %v3318_v53, 16 }
  0x5a   : > { %831 = vrot.lane.b32.xlu1 %v3207_v57, %s3023_s19 }
  0x5b   : > { %829 = vrot.lane.b32.xlu0 %v3179_v39, %s3023_s19 }
  0x5e   : > { %870 = vrot.lane.b32.xlu1 %v566_v9, %s3025_s22 }
  0x5f   : > { %868 = vrot.lane.b32.xlu0 %v558_v63, %s3025_s22 }
  0x62   : > { %634 = vrot.lane.b32.xlu1 %v558_v63, %s3021_s13 }
  0x63   : > { %903 = vrot.lane.b32.xlu0 %v668_v2, %s3026_s23 }
  0x66   : > { %636 = vrot.lane.b32.xlu1 %v566_v9, %s3021_s13 }
  0x67   : > { %905 = vrot.lane.b32.xlu0 %v670_v11, %s3026_s23 }
  0x6a   : > { %695 = vrot.lane.b32.xlu1 %v670_v11, %s3020_s12 }
  0x6b   : > { %693 = vrot.lane.b32.xlu0 %v668_v2, %s3020_s12  ;;  %v605_v2 = vrot.slane %v603_v58, 1 }
  0x6e   : > { %728 = vrot.lane.b32.xlu1 %v3225_v1, %s3018_s29 }
  0x6f   : > { %726 = vrot.lane.b32.xlu0 %v3207_v57, %s3018_s29 }
  0x72   : > { %767 = vrot.lane.b32.xlu1 %v574_v19, %s3022_s16 }
  0x73   : > { %765 = vrot.lane.b32.xlu0 %v566_v9, %s3022_s16  ;;  %v606_v9 = vsel %vm514_vm1, %v601_v0, %v605_v2 }
  0x76   : > { %802 = vrot.lane.b32.xlu1 %v672_v22, %s3019_s30 }
  0x77   : > { %800 = vrot.lane.b32.xlu0 %v670_v11, %s3019_s30 }
  0x7a   : > { %835 = vrot.lane.b32.xlu1 %v3246_v12, %s3023_s19 }
  0x7b   : > { %833 = vrot.lane.b32.xlu0 %v3225_v1, %s3023_s19 }
  0x7e   : > { %874 = vrot.lane.b32.xlu1 %v582_v27, %s3025_s22 }
  0x7f   : > { %872 = vrot.lane.b32.xlu0 %v574_v19, %s3025_s22 }
  0x82   : > { %638 = vrot.lane.b32.xlu1 %v574_v19, %s3021_s13 }
  0x83   : > { %907 = vrot.lane.b32.xlu0 %v672_v22, %s3026_s23 }
  0x86   : > { %640 = vrot.lane.b32.xlu1 %v582_v27, %s3021_s13 }
  0x87   : > { %909 = vrot.lane.b32.xlu0 %v674_v29, %s3026_s23 }
  0x8a   : > { %699 = vrot.lane.b32.xlu1 %v674_v29, %s3020_s12 }
  0x8b   : > { %697 = vrot.lane.b32.xlu0 %v672_v22, %s3020_s12  ;;  %v607_v22 = vshrl.u32 %v3318_v53, 16 }
  0x8d   : > { %v609_v31 = vor.u32 %v607_v22, %v605_v2 }
  0x8e   : > { %732 = vrot.lane.b32.xlu1 %v3261_v21, %s3018_s29 }
  0x8f   : > { %730 = vrot.lane.b32.xlu0 %v3246_v12, %s3018_s29 }
  0x92   : > { %771 = vrot.lane.b32.xlu1 %v590_v35, %s3022_s16 }
  0x93   : > { %769 = vrot.lane.b32.xlu0 %v582_v27, %s3022_s16 }
  0x96   : > { %806 = vrot.lane.b32.xlu1 %v676_v38, %s3019_s30 }
  0x97   : > { %804 = vrot.lane.b32.xlu0 %v674_v29, %s3019_s30  ;;  %v721_v42 = vpop.permute.xlu1 %720 }
  0x98   : > { %v719_v45 = vpop.permute.xlu0 %718 }
  0x9a   : > { %839 = vrot.lane.b32.xlu1 %v3282_v30, %s3023_s19 }
  0x9b   : > { %837 = vrot.lane.b32.xlu0 %v3261_v21, %s3023_s19 }
  0x9c   : > { %v793_v47 = vpop.permute.xlu0 %792  ;;  %v686_v48 = vpop.permute.xlu1 %685 }
  0x9e   : > { %878 = vrot.lane.b32.xlu1 %v598_v46, %s3025_s22 }
  0x9f   : > { %876 = vrot.lane.b32.xlu0 %v590_v35, %s3025_s22 }
  0xa0   : > { %v688_v50 = vpop.permute.xlu1 %687 }
  0xa1   : > { %v627_v51 = vpop.permute.xlu0 %626 }
  0xa2   : > { %642 = vrot.lane.b32.xlu1 %v590_v35, %s3021_s13  ;;  %v929_v59 = vsel %vm927_vm4, %v3152_v13, %v627_v51  ;;  %v615_v51 = vshrl.u32 %v3341_v10, 16 }
  0xa3   : > { %911 = vrot.lane.b32.xlu0 %v676_v38, %s3026_s23  ;;  %v959_v63 = vsel %vm957_vm5, %v929_v59, %v686_v48 }
  0xa4   : > { %v795_v54 = vpop.permute.xlu1 %794  ;;  %v988_v6 = vsel %vm986_vm6, %v959_v63, %v719_v45  ;;  %v3371_v45 = vld [vmem:[%s3132_s28 + $0x68] sm:$0xf]  ;;  %v617_v56 = vor.u32 %v615_v51, %v613_v32 }
  0xa5   : > { %v629_v55 = vpop.permute.xlu0 %628 }
  0xa6   : > { %644 = vrot.lane.b32.xlu1 %v598_v46, %s3021_s13  ;;  %v931_v62 = vsel %vm927_vm4, %v3145_v7, %v629_v55  ;;  %v679_v7 = vrot.slane %v3318_v53, 1 }
  0xa7   : > { %913 = vrot.lane.b32.xlu0 %v678_v52, %s3026_s23  ;;  %v961_v13 = vsel %vm957_vm5, %v931_v62, %v688_v50  ;;  %v435_v62 = vld [vmem:[%s3132_s28 + $0x74] sm:$0xf] }
  0xa8   : > { %v760_v60 = vpop.permute.xlu1 %759  ;;  %v990_v11 = vsel %vm986_vm6, %v961_v13, %v721_v42  ;;  %v680_v18 = vsel %vm657_vm0, %v677_v49, %v679_v7  ;;  %v681_v42 = vrot.slane %v3341_v10, 1 }
  0xa9   : > { %v758_v61 = vpop.permute.xlu0 %757  ;;  %v1019_v19 = vsel %vm1015_vm7, %v990_v11, %v760_v60 }
  0xaa   : > { %703 = vrot.lane.b32.xlu1 %v678_v52, %s3020_s12  ;;  %v1017_v8 = vsel %vm1015_vm7, %v988_v6, %v758_v61  ;;  %v1048_v28 = vsel %vm1044_vm8, %v1019_v19, %v795_v54  ;;  %v3387_v61 = vld [vmem:[%s3132_s28 + $0x70] sm:$0xf] }
  0xab   : > { %701 = vrot.lane.b32.xlu0 %v676_v38, %s3020_s12  ;;  %v1046_v17 = vsel %vm1044_vm8, %v1017_v8, %v793_v47  ;;  %v614_v38 = vsel %vm514_vm1, %v609_v31, %v613_v32  ;;  %v682_v47 = vsel %vm657_vm0, %v679_v7, %v681_v42 }
  0xac   : > { %v828_v4 = vpop.permute.xlu1 %827 }
  0xad   : > { %v826_v5 = vpop.permute.xlu0 %825  ;;  %v1077_v29 = vsel %vm1073_vm9, %v1048_v28, %v828_v4 }
  0xae   : > { %736 = vrot.lane.b32.xlu1 %v3297_v37, %s3018_s29  ;;  %v1075_v20 = vsel %vm1073_vm9, %v1046_v17, %v826_v5  ;;  %v3400_v5 = vcombine.low %v3387_v61, %v435_v62 }
  0xaf   : > { %734 = vrot.lane.b32.xlu0 %v3282_v30, %s3018_s29 }
  0xb0   : > { %v867_v15 = vpop.permute.xlu1 %866  ;;  %v754_v51 = vshrl.u32 %v3400_v5, 16 }
  0xb1   : > { %v865_v16 = vpop.permute.xlu0 %864  ;;  %v1106_v33 = vsel %vm1102_vm10, %v1077_v29, %v867_v15 }
  0xb2   : > { %775 = vrot.lane.b32.xlu1 %v606_v9, %s3022_s16  ;;  %v1104_v24 = vsel %vm1102_vm10, %v1075_v20, %v865_v16 }
  0xb3   : > { %773 = vrot.lane.b32.xlu0 %v598_v46, %s3022_s16  ;;  %v431_v46 = vld [vmem:[%s3132_s28 + $0x6c] sm:$0xf] }
  0xb4   : > { %v631_v25 = vpop.permute.xlu1 %630  ;;  %v3378_v48 = vcombine.low %v3371_v45, %v431_v46  ;;  %v434_v46 = vld [vmem:[%s3132_s28 + $0x74] sm:$0x7] }
  0xb5   : > { %v900_v26 = vpop.permute.xlu0 %899  ;;  %v933_v63 = vsel %vm927_vm4, %v3140_v3, %v631_v25 }
  0xb6   : > { %v1133_v27 = vsel %vm1131_vm11, %v1104_v24, %v900_v26  ;;  %810 = vrot.lane.b32.xlu1 %v680_v18, %s3019_s30  ;;  %v683_v0 = vrot.slane %v3378_v48, 1  ;;  %v623_v17 = vshrl.u32 %v3378_v48, 16 }
  0xb7   : > { %808 = vrot.lane.b32.xlu0 %v678_v52, %s3019_s30  ;;  %2809 = vmatprep.mubr.msk.bf16.mxu0 %vm1182_vm12, %v1133_v27  ;;  %v619_v52 = vshll.u32 %v3378_v48, 16 }
  0xb8   : > { %v633_v34 = vpop.permute.xlu1 %632  ;;  %v684_v11 = vsel %vm657_vm0, %v681_v42, %v683_v0 }
  0xb9   : > { %v902_v35 = vpop.permute.xlu0 %901  ;;  %v621_v58 = vrot.slane %v619_v52, 1  ;;  %v935_v8 = vsel %vm927_vm4, %v3155_v14, %v633_v34  ;;  %v437_v52 = vld [vmem:[%s3132_s28 + $0x78] sm:$0xf] }
  0xba   : > { %v1135_v36 = vsel %vm1131_vm11, %v1106_v33, %v902_v35  ;;  %843 = vrot.lane.b32.xlu1 %v3318_v53, %s3023_s19  ;;  %v3432_v35 = vrot.slane %v3400_v5, 1 }
  0xbb   : > { %841 = vrot.lane.b32.xlu0 %v3297_v37, %s3023_s19  ;;  %2810 = vmatmul.mubr.msk.bf16.vlgmr.msra.gmra.mrb[0].mxu0 %vm1182_vm12, %v1135_v36  ;;  %v622_v4 = vsel %vm514_vm1, %v617_v56, %v621_v58  ;;  %v625_v27 = vor.u32 %v623_v17, %v621_v58 }
  0xbc   : > { %v692_v40 = vpop.permute.xlu1 %691 }
  0xbd   : > { %v690_v41 = vpop.permute.xlu0 %689  ;;  %v965_v15 = vsel %vm957_vm5, %v935_v8, %v692_v40  ;;  %v791_v40 = vsel %vm657_vm0, %v683_v0, %v3432_v35 }
  0xbe   : > { %882 = vrot.lane.b32.xlu1 %v614_v38, %s3025_s22  ;;  %v963_v2 = vsel %vm957_vm5, %v933_v63, %v690_v41 }
  0xbf   : > { %880 = vrot.lane.b32.xlu0 %v606_v9, %s3025_s22 }
  0xc0   : > { %v725_v43 = vpop.permute.xlu1 %724 }
  0xc1   : > { %v723_v44 = vpop.permute.xlu0 %722  ;;  %v994_v19 = vsel %vm986_vm6, %v965_v15, %v725_v43 }
  0xc2   : > { %646 = vrot.lane.b32.xlu1 %v606_v9, %s3021_s13  ;;  %v992_v13 = vsel %vm986_vm6, %v963_v2, %v723_v44 }
  0xc3   : > { %915 = vrot.lane.b32.xlu0 %v680_v18, %s3026_s23 }
  0xc4   : > { %v764_v49 = vpop.permute.xlu1 %763 }
  0xc5   : > { %v762_v50 = vpop.permute.xlu0 %761  ;;  %v1023_v23 = vsel %vm1015_vm7, %v994_v19, %v764_v49 }
  0xc6   : > { %648 = vrot.lane.b32.xlu1 %v614_v38, %s3021_s13  ;;  %v1021_v3 = vsel %vm1015_vm7, %v992_v13, %v762_v50  ;;  %v2665_v50 = vcombine.low %v3387_v61, %v434_v46 }
  0xc7   : > { %917 = vrot.lane.b32.xlu0 %v682_v47, %s3026_s23 }
  0xc8   : > { %v799_v54 = vpop.permute.xlu1 %798 }
  0xc9   : > { %v797_v55 = vpop.permute.xlu0 %796  ;;  %v1052_v25 = vsel %vm1044_vm8, %v1023_v23, %v799_v54  ;;  %v439_v54 = vld [vmem:[%s3132_s28 + $0x7c] sm:$0xf] }
  0xca   : > { %707 = vrot.lane.b32.xlu1 %v682_v47, %s3020_s12  ;;  %v1050_v9 = vsel %vm1044_vm8, %v1021_v3, %v797_v55 }
  0xcb   : > { %705 = vrot.lane.b32.xlu0 %v680_v18, %s3020_s12  ;;  %v750_v18 = vshll.u32 %v3400_v5, 16 }
  0xcc   : > { %v832_v59 = vpop.permute.xlu1 %831 }
  0xcd   : > { %v830_v60 = vpop.permute.xlu0 %829  ;;  %v1081_v26 = vsel %vm1073_vm9, %v1052_v25, %v832_v59  ;;  %v752_v28 = vrot.slane %v750_v18, 1 }
  0xce   : > { %740 = vrot.lane.b32.xlu1 %v3341_v10, %s3018_s29  ;;  %v1079_v16 = vsel %vm1073_vm9, %v1050_v9, %v830_v60  ;;  %v2669_v60 = vcombine.low %v437_v52, %v439_v54 }
  0xcf   : > { %738 = vrot.lane.b32.xlu0 %v3318_v53, %s3018_s29  ;;  %v753_v34 = vsel %vm514_vm1, %v625_v27, %v752_v28  ;;  %v756_v59 = vor.u32 %v754_v51, %v752_v28 }
  0xd0   : > { %v871_v6 = vpop.permute.xlu1 %870  ;;  %v861_v19 = vshrl.u32 %v2669_v60, 16 }
  0xd1   : > { %v869_v7 = vpop.permute.xlu0 %868  ;;  %v1110_v29 = vsel %vm1102_vm10, %v1081_v26, %v871_v6 }
  0xd2   : > { %779 = vrot.lane.b32.xlu1 %v622_v4, %s3022_s16  ;;  %v1108_v14 = vsel %vm1102_vm10, %v1079_v16, %v869_v7  ;;  %v438_v7 = vld [vmem:[%s3132_s28 + $0x7c] sm:$0x7] }
  0xd3   : > { %777 = vrot.lane.b32.xlu0 %v614_v38, %s3022_s16  ;;  %v2668_v17 = vcombine.low %v437_v52, %v438_v7 }
  0xd4   : > { %v635_v20 = vpop.permute.xlu1 %634 }
  0xd5   : > { %v904_v22 = vpop.permute.xlu0 %903  ;;  %v937_v58 = vsel %vm927_vm4, %v3179_v39, %v635_v20 }
  0xd6   : > { %v1137_v24 = vsel %vm1131_vm11, %v1108_v14, %v904_v22  ;;  %814 = vrot.lane.b32.xlu1 %v684_v11, %s3019_s30 }
  0xd7   : > { %812 = vrot.lane.b32.xlu0 %v682_v47, %s3019_s30  ;;  %2813 = vmatprep.mubr.msk.bf16.mxu0 %vm1182_vm12, %v1137_v24 }
  0xd8   : > { %v637_v31 = vpop.permute.xlu1 %636 }
  0xd9   : > { %v906_v32 = vpop.permute.xlu0 %905 }
  0xda   : > { %v1139_v33 = vsel %vm1131_vm11, %v1110_v29, %v906_v32  ;;  %847 = vrot.lane.b32.xlu1 %v3378_v48, %s3023_s19 }
  0xdb   : > { %845 = vrot.lane.b32.xlu0 %v3341_v10, %s3023_s19  ;;  %2814 = vmatmul.mubr.msk.bf16.gmra.mrb[4].mxu0 %vm1182_vm12, %v1139_v33 }
  0xdc   : > { %v696_v36 = vpop.permute.xlu1 %695 }
  0xdd   : > { %v694_v38 = vpop.permute.xlu0 %693 }
  0xde   : > { %886 = vrot.lane.b32.xlu1 %v753_v34, %s3025_s22  ;;  %v967_v62 = vsel %vm957_vm5, %v937_v58, %v694_v38 }
  0xdf   : > { %884 = vrot.lane.b32.xlu0 %v622_v4, %s3025_s22 }
  0xe0   : > { %v729_v41 = vpop.permute.xlu1 %728 }
  0xe1   : > { %v727_v42 = vpop.permute.xlu0 %726 }
  0xe2   : > { %921 = vrot.lane.b32.xlu1 %v791_v40, %s3026_s23  ;;  %v996_v61 = vsel %vm986_vm6, %v967_v62, %v727_v42 }
  0xe3   : > { %919 = vrot.lane.b32.xlu0 %v684_v11, %s3026_s23 }
  0xe4   : > { %v768_v43 = vpop.permute.xlu1 %767 }
  0xe5   : > { %v766_v44 = vpop.permute.xlu0 %765 }
  0xe6   : > { %652 = vrot.lane.b32.xlu1 %v625_v27, %s3021_s13  ;;  %v1025_v2 = vsel %vm1015_vm7, %v996_v61, %v766_v44  ;;  %v897_v27 = vrot.slane %v2669_v60, 1 }
  0xe7   : > { %650 = vrot.lane.b32.xlu0 %v622_v4, %s3021_s13  ;;  %v939_v4 = vsel %vm927_vm4, %v3207_v57, %v637_v31  ;;  %s3036_s13 = smov 70  }
  0xe8   : > { %v803_v47 = vpop.permute.xlu1 %802  ;;  %v969_v13 = vsel %vm957_vm5, %v939_v4, %v696_v36  ;;  %v898_v31 = vsel %vm657_vm0, %v3432_v35, %v897_v27 }
  0xe9   : > { %v801_v49 = vpop.permute.xlu0 %800  ;;  %v998_v3 = vsel %vm986_vm6, %v969_v13, %v729_v41 }
  0xea   : > { %711 = vrot.lane.b32.xlu1 %v683_v0, %s3020_s12  ;;  %v1054_v39 = vsel %vm1044_vm8, %v1025_v2, %v801_v49  ;;  %v1027_v57 = vsel %vm1015_vm7, %v998_v3, %v768_v43 }
  0xeb   : > { %709 = vrot.lane.b32.xlu0 %v684_v11, %s3020_s12  ;;  %v1056_v16 = vsel %vm1044_vm8, %v1027_v57, %v803_v47  ;;  %s3030_s12 = smov 20  }
  0xec   : > { %v836_v55 = vpop.permute.xlu1 %835 }
  0xed   : > { %v834_v56 = vpop.permute.xlu0 %833  ;;  %v1085_v14 = vsel %vm1073_vm9, %v1056_v16, %v836_v55 }
  0xee   : > { %744 = vrot.lane.b32.xlu1 %v2665_v50, %s3018_s29  ;;  %v1083_v6 = vsel %vm1073_vm9, %v1054_v39, %v834_v56 }
  0xef   : > { %742 = vrot.lane.b32.xlu0 %v3378_v48, %s3018_s29  ;;  %v857_v48 = vshll.u32 %v2669_v60, 16  ;;  %s3034_s29 = smov 60  }
  0xf0   : > { %v875_v63 = vpop.permute.xlu1 %874 }
  0xf1   : > { %v873_v0 = vpop.permute.xlu0 %872  ;;  %v859_v18 = vrot.slane %v857_v48, 1  ;;  %v1114_v20 = vsel %vm1102_vm10, %v1085_v14, %v875_v63 }
  0xf2   : > { %783 = vrot.lane.b32.xlu1 %v756_v59, %s3022_s16  ;;  %v1112_v8 = vsel %vm1102_vm10, %v1083_v6, %v873_v0 }
  0xf3   : > { %781 = vrot.lane.b32.xlu0 %v753_v34, %s3022_s16  ;;  %v863_v25 = vor.u32 %v861_v19, %v859_v18  ;;  %v860_v26 = vsel %vm514_vm1, %v756_v59, %v859_v18  ;;  %s3039_s16 = smov 32  }
  0xf4   : > { %v639_v9 = vpop.permute.xlu1 %638 }
  0xf5   : > { %v908_v11 = vpop.permute.xlu0 %907  ;;  %v941_v42 = vsel %vm927_vm4, %v3225_v1, %v639_v9 }
  0xf6   : > { %v1141_v15 = vsel %vm1131_vm11, %v1112_v8, %v908_v11  ;;  %818 = vrot.lane.b32.xlu1 %v3432_v35, %s3019_s30 }
  0xf7   : > { %816 = vrot.lane.b32.xlu0 %v791_v40, %s3019_s30  ;;  %2817 = vmatprep.mubr.msk.bf16.mxu0 %vm1182_vm12, %v1141_v15  ;;  %s3035_s30 = smov 50  }
  0xf8   : > { %v641_v22 = vpop.permute.xlu1 %640 }
  0xf9   : > { %v910_v23 = vpop.permute.xlu0 %909  ;;  %v943_v49 = vsel %vm927_vm4, %v3246_v12, %v641_v22 }
  0xfa   : > { %v1143_v24 = vsel %vm1131_vm11, %v1114_v20, %v910_v23  ;;  %851 = vrot.lane.b32.xlu1 %v2668_v17, %s3023_s19 }
  0xfb   : > { %849 = vrot.lane.b32.xlu0 %v3400_v5, %s3023_s19  ;;  %2818 = vmatmul.mubr.msk.bf16.gmra.mrb[8].mxu0 %vm1182_vm12, %v1143_v24  ;;  %s2869_s19 = smul.u32 24, %s3981_s18 }
  0xfc   : > { %v700_v28 = vpop.permute.xlu1 %699 }
  0xfd   : > { %v698_v29 = vpop.permute.xlu0 %697  ;;  %v973_v51 = vsel %vm957_vm5, %v943_v49, %v700_v28 }
  0xfe   : > { %890 = vrot.lane.b32.xlu1 %v863_v25, %s3025_s22  ;;  %v971_v43 = vsel %vm957_vm5, %v941_v42, %v698_v29 }
  0xff   : > { %888 = vrot.lane.b32.xlu0 %v860_v26, %s3025_s22  ;;  %s2694_s22 = sld [smem:[#allocation6 + $0x1]] }
 0x100   : > { %v733_v32 = vpop.permute.xlu1 %732 }
 0x101   : > { %v731_v33 = vpop.permute.xlu0 %730  ;;  %v1002_v54 = vsel %vm986_vm6, %v973_v51, %v733_v32 }
 0x102   : > { %925 = vrot.lane.b32.xlu1 %v897_v27, %s3026_s23  ;;  %v1000_v44 = vsel %vm986_vm6, %v971_v43, %v731_v33 }
 0x103   : > { %923 = vrot.lane.b32.xlu0 %v898_v31, %s3026_s23  ;;  %s3042_s23 = smov 96  }
 0x104   : > { %v772_v5 = vpop.permute.xlu1 %771 }
 0x105   : > { %v770_v34 = vpop.permute.xlu0 %769  ;;  %v1031_v58 = vsel %vm1015_vm7, %v1002_v54, %v772_v5 }
 0x106   : > { %v1029_v47 = vsel %vm1015_vm7, %v1000_v44, %v770_v34 }
 0x108   : > { %v807_v36 = vpop.permute.xlu1 %806 }
 0x109   : > { %v805_v38 = vpop.permute.xlu0 %804  ;;  %v1060_v60 = vsel %vm1044_vm8, %v1031_v58, %v807_v36 }
 0x10a   : > { %v1058_v50 = vsel %vm1044_vm8, %v1029_v47, %v805_v38 }
 0x10c   : > { %v840_v40 = vpop.permute.xlu1 %839 }
 0x10d   : > { %v838_v41 = vpop.permute.xlu0 %837  ;;  %v1089_v12 = vsel %vm1073_vm9, %v1060_v60, %v840_v40 }
 0x10e   : > { %v1087_v52 = vsel %vm1073_vm9, %v1058_v50, %v838_v41 }
 0x110   : > { %v879_v35 = vpop.permute.xlu1 %878 }
 0x111   : > { %v877_v46 = vpop.permute.xlu0 %876  ;;  %v1118_v62 = vsel %vm1102_vm10, %v1089_v12, %v879_v35 }
 0x112   : > { %v1116_v1 = vsel %vm1102_vm10, %v1087_v52, %v877_v46 }
 0x114   : > { %v643_v55 = vpop.permute.xlu1 %642 }
 0x115   : > { %v912_v56 = vpop.permute.xlu0 %911  ;;  %v945_v11 = vsel %vm927_vm4, %v3261_v21, %v643_v55 }
 0x116   : > { %v1145_v59 = vsel %vm1131_vm11, %v1116_v1, %v912_v56 }
 0x117   : > { %2821 = vmatprep.mubr.msk.bf16.mxu0 %vm1182_vm12, %v1145_v59 }
 0x118   : > { %v645_v61 = vpop.permute.xlu1 %644 }
 0x119   : > { %v914_v63 = vpop.permute.xlu0 %913  ;;  %v947_v19 = vsel %vm927_vm4, %v3282_v30, %v645_v61 }
 0x11a   : > { %v1147_v0 = vsel %vm1131_vm11, %v1118_v62, %v914_v63 }
 0x11b   : > { %2822 = vmatmul.mubr.msk.bf16.gmra.mrb[12].mxu0 %vm1182_vm12, %v1147_v0 }
 0x11c   : > { %v704_v2 = vpop.permute.xlu1 %703 }
 0x11d   : > { %v702_v4 = vpop.permute.xlu0 %701  ;;  %v977_v20 = vsel %vm957_vm5, %v947_v19, %v704_v2 }
 0x11e   : > { %v975_v57 = vsel %vm957_vm5, %v945_v11, %v702_v4 }
 0x120   : > { %v737_v39 = vpop.permute.xlu1 %736 }
 0x121   : > { %v735_v48 = vpop.permute.xlu0 %734  ;;  %v1006_v23 = vsel %vm986_vm6, %v977_v20, %v737_v39 }
 0x122   : > { %v1004_v15 = vsel %vm986_vm6, %v975_v57, %v735_v48 }
 0x124   : > { %v776_v13 = vpop.permute.xlu1 %775 }
 0x125   : > { %v774_v6 = vpop.permute.xlu0 %773  ;;  %v1035_v26 = vsel %vm1015_vm7, %v1006_v23, %v776_v13 }
 0x126   : > { %v1033_v18 = vsel %vm1015_vm7, %v1004_v15, %v774_v6 }
 0x128   : > { %v811_v7 = vpop.permute.xlu1 %810 }
 0x129   : > { %v809_v3 = vpop.permute.xlu0 %808  ;;  %v1064_v28 = vsel %vm1044_vm8, %v1035_v26, %v811_v7 }
 0x12a   : > { %v1062_v14 = vsel %vm1044_vm8, %v1033_v18, %v809_v3 }
 0x12c   : > { %v844_v8 = vpop.permute.xlu1 %843 }
 0x12d   : > { %v842_v9 = vpop.permute.xlu0 %841  ;;  %v1093_v30 = vsel %vm1073_vm9, %v1064_v28, %v844_v8  ;;  %v430_v8 = vld [vmem:[%s3132_s28 + $0x6c] sm:$0x7]  ;;  %s3028_s28 = smov 80  }
 0x12e   : > { %v1091_v22 = vsel %vm1073_vm9, %v1062_v14, %v842_v9  ;;  %v2662_v57 = vcombine.low %v3371_v45, %v430_v8 }
 0x130   : > { %v883_v16 = vpop.permute.xlu1 %882 }
 0x131   : > { %v881_v17 = vpop.permute.xlu0 %880  ;;  %v1122_v29 = vsel %vm1102_vm10, %v1093_v30, %v883_v16 }
 0x132   : > { %v1120_v21 = vsel %vm1102_vm10, %v1091_v22, %v881_v17 }
 0x134   : > { %v647_v24 = vpop.permute.xlu1 %646 }
 0x135   : > { %v916_v25 = vpop.permute.xlu0 %915  ;;  %v949_v46 = vsel %vm927_vm4, %v3297_v37, %v647_v24 }
 0x136   : > { %v1149_v27 = vsel %vm1131_vm11, %v1120_v21, %v916_v25 }
 0x137   : > { %2825 = vmatprep.mubr.msk.bf16.mxu0 %vm1182_vm12, %v1149_v27 }
 0x138   : > { %v649_v31 = vpop.permute.xlu1 %648 }
 0x139   : > { %v918_v32 = vpop.permute.xlu0 %917  ;;  %v951_v47 = vsel %vm927_vm4, %v3318_v53, %v649_v31 }
 0x13a   : > { %v1151_v33 = vsel %vm1131_vm11, %v1122_v29, %v918_v32 }
 0x13b   : > { %2826 = vmatmul.mubr.msk.bf16.gmra.mrb[16].mxu0 %vm1182_vm12, %v1151_v33 }
 0x13c   : > { %v708_v5 = vpop.permute.xlu1 %707 }
 0x13d   : > { %v706_v34 = vpop.permute.xlu0 %705  ;;  %v981_v49 = vsel %vm957_vm5, %v951_v47, %v708_v5  ;;  %v3572_v5 = vld [vmem:[%s3967_s2] ss:$0 sm:$0xff] }
 0x13e   : > { %v979_v50 = vsel %vm957_vm5, %v949_v46, %v706_v34 }
 0x140   : > { %v741_v36 = vpop.permute.xlu1 %740 }
 0x141   : > { %v739_v38 = vpop.permute.xlu0 %738  ;;  %v1010_v51 = vsel %vm986_vm6, %v981_v49, %v741_v36  ;;  %v3574_v36 = vstv %s402_s24 }
 0x142   : > { %v1008_v52 = vsel %vm986_vm6, %v979_v50, %v739_v38 }
 0x144   : > { %v780_v40 = vpop.permute.xlu1 %779 }
 0x145   : > { %v778_v41 = vpop.permute.xlu0 %777  ;;  %v1039_v55 = vsel %vm1015_vm7, %v1010_v51, %v780_v40 }
 0x146   : > { %v1037_v56 = vsel %vm1015_vm7, %v1008_v52, %v778_v41 }
 0x148   : > { %v815_v42 = vpop.permute.xlu1 %814 }
 0x149   : > { %v813_v43 = vpop.permute.xlu0 %812  ;;  %v1068_v58 = vsel %vm1044_vm8, %v1039_v55, %v815_v42 }
 0x14a   : > { %v1066_v37 = vsel %vm1044_vm8, %v1037_v56, %v813_v43 }
 0x14c   : > { %v848_v44 = vpop.permute.xlu1 %847 }
 0x14d   : > { %v846_v35 = vpop.permute.xlu0 %845  ;;  %v1097_v53 = vsel %vm1073_vm9, %v1068_v58, %v848_v44 }
 0x14e   : > { %v1095_v59 = vsel %vm1073_vm9, %v1066_v37, %v846_v35 }
 0x150   : > { %v887_v54 = vpop.permute.xlu1 %886 }
 0x151   : > { %v885_v1 = vpop.permute.xlu0 %884  ;;  %v1126_v60 = vsel %vm1102_vm10, %v1097_v53, %v887_v54 }
 0x152   : > { %v1124_v12 = vsel %vm1102_vm10, %v1095_v59, %v885_v1 }
 0x154   : > { %v922_v62 = vpop.permute.xlu1 %921 }
 0x155   : > { %v920_v61 = vpop.permute.xlu0 %919  ;;  %v1155_v63 = vsel %vm1131_vm11, %v1126_v60, %v922_v62 }
 0x156   : > { %v1153_v0 = vsel %vm1131_vm11, %v1124_v12, %v920_v61  ;;  %v1492_v12 = vld [vmem:[#allocation3] sm:$0xf] }
 0x157   : > { %2829 = vmatprep.mubr.msk.bf16.mxu0 %vm1182_vm12, %v1153_v0 }
 0x158   : > { %2830 = vmatmul.mubr.msk.bf16.gmra.mrb[20].mxu0 %vm1182_vm12, %v1155_v63  ;;  %v653_v2 = vpop.permute.xlu1 %652 }
 0x159   : > { %v651_v4 = vpop.permute.xlu0 %650  ;;  %v956_v17 = vsel %vm927_vm4, %v2662_v57, %v653_v2 }
 0x15a   : > { %v953_v18 = vsel %vm927_vm4, %v3341_v10, %v651_v4 }
 0x15c   : > { %v712_v39 = vpop.permute.xlu1 %711 }
 0x15d   : > { %v710_v48 = vpop.permute.xlu0 %709  ;;  %v985_v19 = vsel %vm957_vm5, %v956_v17, %v712_v39 }
 0x15e   : > { %v983_v14 = vsel %vm957_vm5, %v953_v18, %v710_v48  ;;  %vm1489_vm5 = vcmask 76800  }
 0x160   : > { %v745_v13 = vpop.permute.xlu1 %744 }
 0x161   : > { %v743_v6 = vpop.permute.xlu0 %742  ;;  %v1014_v20 = vsel %vm986_vm6, %v985_v19, %v745_v13 }
 0x162   : > { %v1012_v22 = vsel %vm986_vm6, %v983_v14, %v743_v6  ;;  %vm1490_vm6 = vsmask.f32 3328 }
 0x164   : > { %v784_v7 = vpop.permute.xlu1 %783 }
 0x165   : > { %v782_v3 = vpop.permute.xlu0 %781  ;;  %v1043_v24 = vsel %vm1015_vm7, %v1014_v20, %v784_v7 }
 0x166   : > { %v1041_v45 = vsel %vm1015_vm7, %v1012_v22, %v782_v3  ;;  %vm1491_vm7 = vmand %vm1489_vm5, %vm1490_vm6 }
 0x168   : > { %v819_v9 = vpop.permute.xlu1 %818 }
 0x169   : > { %v817_v11 = vpop.permute.xlu0 %816  ;;  %v1072_v25 = vsel %vm1044_vm8, %v1043_v24, %v819_v9 }
 0x16a   : > { %v1070_v26 = vsel %vm1044_vm8, %v1041_v45, %v817_v11 }
 0x16c   : > { %v852_v15 = vpop.permute.xlu1 %851 }
 0x16d   : > { %v850_v16 = vpop.permute.xlu0 %849  ;;  %v1101_v10 = vsel %vm1073_vm9, %v1072_v25, %v852_v15 }
 0x16e   : > { %v1099_v27 = vsel %vm1073_vm9, %v1070_v26, %v850_v16 }
 0x170   : > { %v891_v23 = vpop.permute.xlu1 %890 }
 0x171   : > { %v889_v21 = vpop.permute.xlu0 %888  ;;  %v1130_v28 = vsel %vm1102_vm10, %v1101_v10, %v891_v23 }
 0x172   : > { %v1128_v30 = vsel %vm1102_vm10, %v1099_v27, %v889_v21 }
 0x174   : > { %v926_v29 = vpop.permute.xlu1 %925 }
 0x175   : > { %v924_v31 = vpop.permute.xlu0 %923  ;;  %v1159_v32 = vsel %vm1131_vm11, %v1130_v28, %v926_v29 }
 0x176   : > { %v1157_v33 = vsel %vm1131_vm11, %v1128_v30, %v924_v31 }
 0x177   : > { %2833 = vmatprep.mubr.msk.bf16.mxu0 %vm1182_vm12, %v1157_v33 }
 0x178   : > { %2834 = vmatmul.mubr.msk.bf16.gmra.mrb[24].mxu0 %vm1182_vm12, %v1159_v32 }
 0x18e   : > { %v2811_v34 = vpop.f32.mrb[0].mxu0 }
 0x18f   : > { %v1261_v38 = vadd.f32 %v2811_v34, %v3572_v5  ;;  %v1252_v40 = vpop.f32.mrb[1].mxu0 }
 0x190   : > { %v1253_v41 = vadd.f32 %v3572_v5, %v1252_v40  ;;  %v2812_v42 = vpop.f32.mrb[2].mxu0 }
 0x191   : > { %vm1365_vm13 = vcmp.ge.f32.partialorder %v1261_v38, 0.0  ;;  %v1394_v43 = vmul.f32 %v3574_v36, %v1261_v38  ;;  %v1264_v44 = vadd.f32 %v2812_v42, %v3572_v5  ;;  %v1255_v35 = vpop.f32.mrb[3].mxu0 }
 0x192   : > { %vm1363_vm15 = vcmp.ge.f32.partialorder %v1253_v41, 0.0  ;;  %v1392_v46 = vmul.f32 %v3574_v36, %v1253_v41  ;;  %v1256_v47 = vadd.f32 %v3572_v5, %v1255_v35 }
 0x193   : > { %v1422_v49 = vsel %vm1365_vm13, %v1261_v38, %v1394_v43  ;;  %vm1366_vm3 = vcmp.ge.f32.partialorder %v1264_v44, 0.0  ;;  %v1395_v50 = vmul.f32 %v3574_v36, %v1264_v44  ;;  %vm1521_vm13 = vcmask 76803  }
 0x194   : > { %1451 = vst.msk [vmem:[#allocation2 + $0x10] sm:$0xff] %vm1448_vm14, %v1422_v49  ;;  %v1420_v51 = vsel %vm1363_vm15, %v1253_v41, %v1392_v46  ;;  %vm1364_vm4 = vcmp.ge.f32.partialorder %v1256_v47, 0.0  ;;  %v1393_v52 = vmul.f32 %v3574_v36, %v1256_v47  ;;  %vm1522_vm15 = vsmask.f32 7950 }
 0x195   : > { %1449 = vst.msk [vmem:[#allocation2] sm:$0xff] %vm1448_vm14, %v1420_v51  ;;  %v1423_v54 = vsel %vm1366_vm3, %v1264_v44, %v1395_v50  ;;  %vm1523_vm3 = vmand %vm1521_vm13, %vm1522_vm15 }
 0x196   : > { %1452 = vst.msk [vmem:[#allocation2 + $0x18] sm:$0xff] %vm1448_vm14, %v1423_v54  ;;  %v1421_v1 = vsel %vm1364_vm4, %v1256_v47, %v1393_v52  ;;  %vm1527_vm4 = vcmask 75776  }
 0x197   : > { %1450 = vst.msk [vmem:[#allocation2 + $0x8] sm:$0xff] %vm1448_vm14, %v1421_v1 }
 0x19d   : > { %v1483_v55 = vld [vmem:[#allocation2 + $0x10] ss:$2 sm:$0x7f]  ;;  %v1485_v56 = vld [vmem:[#allocation2 + $0x11] ss:$2 sm:$0x7f] }
 0x19e   : > { %v1486_v58 = vmax.f32 %v1483_v55, %v1485_v56  ;;  %v1478_v37 = vld [vmem:[#allocation2] ss:$2 sm:$0x7f]  ;;  %v1480_v53 = vld [vmem:[#allocation2 + $0x1] ss:$2 sm:$0x7f] }
 0x19f   : > { %v1481_v59 = vmax.f32 %v1478_v37, %v1480_v53 }
 0x1a1   : > { %v1487_v60 = vmax.f32 %v1481_v59, %v1486_v58  ;;  %v1553_v59 = vld [vmem:[#allocation3 + $0x8] sm:$0x7] }
 0x1a3   : > { %v1488_v62 = vpack.c.bf16 %v1487_v60, %v1487_v60 }
 0x1a5   : > { %v1493_v61 = vsel %vm1491_vm7, %v1488_v62, %v1492_v12 }
 0x1a6   : > { %1494 = vst [vmem:[#allocation3] sm:$0xf] %v1493_v61 }
 0x1ad   : > { %v1524_v10 = vld [vmem:[#allocation3] sm:$0x8] }
 0x1ae   : > { %v2815_v63 = vpop.f32.mrb[4].mxu0 }
 0x1af   : > { %v1277_v0 = vadd.f32 %v2815_v63, %v3572_v5  ;;  %v1268_v2 = vpop.f32.mrb[5].mxu0 }
 0x1b0   : > { %v1269_v4 = vadd.f32 %v3572_v5, %v1268_v2  ;;  %v2816_v39 = vpop.f32.mrb[6].mxu0 }
 0x1b1   : > { %vm1369_vm9 = vcmp.ge.f32.partialorder %v1277_v0, 0.0  ;;  %v1398_v48 = vmul.f32 %v3574_v36, %v1277_v0  ;;  %v1280_v13 = vadd.f32 %v2816_v39, %v3572_v5  ;;  %v1271_v6 = vpop.f32.mrb[7].mxu0 }
 0x1b2   : > { %vm1367_vm10 = vcmp.ge.f32.partialorder %v1269_v4, 0.0  ;;  %v1396_v7 = vmul.f32 %v3574_v36, %v1269_v4  ;;  %v1272_v3 = vadd.f32 %v3572_v5, %v1271_v6 }
 0x1b3   : > { %v1426_v8 = vsel %vm1369_vm9, %v1277_v0, %v1398_v48  ;;  %vm1370_vm11 = vcmp.ge.f32.partialorder %v1280_v13, 0.0  ;;  %v1399_v9 = vmul.f32 %v3574_v36, %v1280_v13 }
 0x1b4   : > { %1455 = vst.msk [vmem:[#allocation2 + $0x30] sm:$0xff] %vm1448_vm14, %v1426_v8  ;;  %v1424_v11 = vsel %vm1367_vm10, %v1269_v4, %v1396_v7  ;;  %vm1368_vm12 = vcmp.ge.f32.partialorder %v1272_v3, 0.0  ;;  %v1397_v57 = vmul.f32 %v3574_v36, %v1272_v3  ;;  %vm1551_vm10 = vsmask.f32 2304 }
 0x1b5   : > { %1453 = vst.msk [vmem:[#allocation2 + $0x20] sm:$0xff] %vm1448_vm14, %v1424_v11  ;;  %v1427_v15 = vsel %vm1370_vm11, %v1280_v13, %v1399_v9  ;;  %vm1552_vm11 = vmand %vm1527_vm4, %vm1551_vm10 }
 0x1b6   : > { %1456 = vst.msk [vmem:[#allocation2 + $0x38] sm:$0xff] %vm1448_vm14, %v1427_v15  ;;  %v1425_v16 = vsel %vm1368_vm12, %v1272_v3, %v1397_v57 }
 0x1b7   : > { %1454 = vst.msk [vmem:[#allocation2 + $0x28] sm:$0xff] %vm1448_vm14, %v1425_v16 }
 0x1bd   : > { %v1501_v17 = vld [vmem:[#allocation2 + $0x30] ss:$2 sm:$0x7f]  ;;  %v1503_v18 = vld [vmem:[#allocation2 + $0x31] ss:$2 sm:$0x7f] }
 0x1be   : > { %v1504_v19 = vmax.f32 %v1501_v17, %v1503_v18  ;;  %v1496_v14 = vld [vmem:[#allocation2 + $0x20] ss:$2 sm:$0x7f]  ;;  %v1498_v20 = vld [vmem:[#allocation2 + $0x21] ss:$2 sm:$0x7f] }
 0x1bf   : > { %v1499_v22 = vmax.f32 %v1496_v14, %v1498_v20 }
 0x1c1   : > { %v1505_v23 = vmax.f32 %v1499_v22, %v1504_v19 }
 0x1c3   : > { %v2762_v21 = vpack.c.bf16 %v1505_v23, %v1505_v23 }
 0x1c5   : > { %v1511_v24 = vshll.u32 %v2762_v21, 16  ;;  %v1514_v45 = vshrl.u32 %v2762_v21, 16 }
 0x1c7   : > { %v1513_v25 = vrot.slane %v1511_v24, 5  ;;  %v1516_v26 = vrot.slane %v1514_v45, 4 }
 0x1c9   : > { %v1517_v27 = vor.u32 %v1516_v26, %v1513_v25  ;;  %v1525_v28 = vsel %vm1523_vm3, %v1513_v25, %v1524_v10 }
 0x1ca   : > { %1526 = vst [vmem:[#allocation3] sm:$0x8] %v1525_v28 }
 0x1cb   : > { %v1518_v30 = vrot.slane %v1517_v27, 4 }
 0x1cd   : > { %1528 = vst.msk [vmem:[#allocation3 + $0x4] sm:$0x7] %vm1527_vm4, %v1518_v30  ;;  %vm1582_vm4 = vcmask 76802  }
 0x1ce   : > { %v2819_v29 = vpop.f32.mrb[8].mxu0 }
 0x1cf   : > { %v1293_v31 = vadd.f32 %v2819_v29, %v3572_v5  ;;  %v1284_v32 = vpop.f32.mrb[9].mxu0 }
 0x1d0   : > { %v1285_v33 = vadd.f32 %v3572_v5, %v1284_v32  ;;  %v2820_v34 = vpop.f32.mrb[10].mxu0 }
 0x1d1   : > { %vm1373_vm5 = vcmp.ge.f32.partialorder %v1293_v31, 0.0  ;;  %v1402_v38 = vmul.f32 %v3574_v36, %v1293_v31  ;;  %v1296_v40 = vadd.f32 %v2820_v34, %v3572_v5  ;;  %v1287_v41 = vpop.f32.mrb[11].mxu0 }
 0x1d2   : > { %vm1371_vm6 = vcmp.ge.f32.partialorder %v1285_v33, 0.0  ;;  %v1400_v42 = vmul.f32 %v3574_v36, %v1285_v33  ;;  %v1288_v43 = vadd.f32 %v3572_v5, %v1287_v41 }
 0x1d3   : > { %v1430_v44 = vsel %vm1373_vm5, %v1293_v31, %v1402_v38  ;;  %vm1374_vm7 = vcmp.ge.f32.partialorder %v1296_v40, 0.0  ;;  %v1403_v35 = vmul.f32 %v3574_v36, %v1296_v40  ;;  %vm1583_vm5 = vsmask.f32 7946 }
 0x1d4   : > { %1459 = vst.msk [vmem:[#allocation2 + $0x50] sm:$0xff] %vm1448_vm14, %v1430_v44  ;;  %v1428_v46 = vsel %vm1371_vm6, %v1285_v33, %v1400_v42  ;;  %vm1372_vm9 = vcmp.ge.f32.partialorder %v1288_v43, 0.0  ;;  %v1401_v47 = vmul.f32 %v3574_v36, %v1288_v43  ;;  %vm1584_vm6 = vmand %vm1582_vm4, %vm1583_vm5 }
 0x1d5   : > { %1457 = vst.msk [vmem:[#allocation2 + $0x40] sm:$0xff] %vm1448_vm14, %v1428_v46  ;;  %v1431_v49 = vsel %vm1374_vm7, %v1296_v40, %v1403_v35  ;;  %vm1588_vm7 = vcmask 74752  }
 0x1d6   : > { %1460 = vst.msk [vmem:[#allocation2 + $0x58] sm:$0xff] %vm1448_vm14, %v1431_v49  ;;  %v1429_v50 = vsel %vm1372_vm9, %v1288_v43, %v1401_v47 }
 0x1d7   : > { %1458 = vst.msk [vmem:[#allocation2 + $0x48] sm:$0xff] %vm1448_vm14, %v1429_v50 }
 0x1dd   : > { %v1535_v51 = vld [vmem:[#allocation2 + $0x50] ss:$2 sm:$0x7f]  ;;  %v1537_v52 = vld [vmem:[#allocation2 + $0x51] ss:$2 sm:$0x7f] }
 0x1de   : > { %v1538_v54 = vmax.f32 %v1535_v51, %v1537_v52  ;;  %v1530_v1 = vld [vmem:[#allocation2 + $0x40] ss:$2 sm:$0x7f]  ;;  %v1532_v55 = vld [vmem:[#allocation2 + $0x41] ss:$2 sm:$0x7f] }
 0x1df   : > { %v1533_v56 = vmax.f32 %v1530_v1, %v1532_v55 }
 0x1e1   : > { %v1539_v58 = vmax.f32 %v1533_v56, %v1538_v54 }
 0x1e3   : > { %v2763_v37 = vpack.c.bf16 %v1539_v58, %v1539_v58 }
 0x1e5   : > { %v1544_v53 = vrot.slane %v2763_v37, 5 }
 0x1e7   : > { %v1545_v60 = vrot.slane %v1544_v53, 4  ;;  %1549 = vst.msk [vmem:[#allocation3 + $0x4] sm:$0x8] %vm1521_vm13, %v1544_v53 }
 0x1e9   : > { %v1554_v12 = vsel %vm1552_vm11, %v1545_v60, %v1553_v59  ;;  %v1614_v60 = vld [vmem:[#allocation3 + $0x10] sm:$0x3] }
 0x1ea   : > { %1555 = vst [vmem:[#allocation3 + $0x8] sm:$0x7] %v1554_v12 }
 0x1ee   : > { %v2823_v62 = vpop.f32.mrb[12].mxu0  ;;  %v1680_v44 = vld [vmem:[#allocation3 + $0x4] sm:$0xf] }
 0x1ef   : > { %v1309_v61 = vadd.f32 %v2823_v62, %v3572_v5  ;;  %v1300_v63 = vpop.f32.mrb[13].mxu0  ;;  %v1679_v62 = vld [vmem:[#allocation3] sm:$0xf] }
 0x1f0   : > { %v1301_v0 = vadd.f32 %v3572_v5, %v1300_v63  ;;  %v2824_v2 = vpop.f32.mrb[14].mxu0  ;;  %v3651_v63 = vcombine.low %v1679_v62, %v1680_v44 }
 0x1f1   : > { %vm1377_vm12 = vcmp.ge.f32.partialorder %v1309_v61, 0.0  ;;  %v1406_v4 = vmul.f32 %v3574_v36, %v1309_v61  ;;  %v1312_v39 = vadd.f32 %v2824_v2, %v3572_v5  ;;  %v1303_v48 = vpop.f32.mrb[15].mxu0  ;;  %v1585_v26 = vld [vmem:[#allocation3 + $0x8] sm:$0xc] }
 0x1f2   : > { %vm1375_vm15 = vcmp.ge.f32.partialorder %v1301_v0, 0.0  ;;  %v1404_v13 = vmul.f32 %v3574_v36, %v1301_v0  ;;  %v1304_v6 = vadd.f32 %v3572_v5, %v1303_v48 }
 0x1f3   : > { %v1434_v7 = vsel %vm1377_vm12, %v1309_v61, %v1406_v4  ;;  %vm1378_vm13 = vcmp.ge.f32.partialorder %v1312_v39, 0.0  ;;  %v1407_v3 = vmul.f32 %v3574_v36, %v1312_v39  ;;  %v1684_v61 = vld [vmem:[#allocation3] sm:$0xe] }
 0x1f4   : > { %1463 = vst.msk [vmem:[#allocation2 + $0x70] sm:$0xff] %vm1448_vm14, %v1434_v7  ;;  %v1432_v8 = vsel %vm1375_vm15, %v1301_v0, %v1404_v13  ;;  %vm1376_vm3 = vcmp.ge.f32.partialorder %v1304_v6, 0.0  ;;  %v1405_v9 = vmul.f32 %v3574_v36, %v1304_v6  ;;  %vm1612_vm15 = vsmask.f32 1280  ;;  %v1686_v0 = vld [vmem:[#allocation3] sm:$0x8] }
 0x1f5   : > { %1461 = vst.msk [vmem:[#allocation2 + $0x60] sm:$0xff] %vm1448_vm14, %v1432_v8  ;;  %v1435_v11 = vsel %vm1378_vm13, %v1312_v39, %v1407_v3  ;;  %vm1613_vm13 = vmand %vm1588_vm7, %vm1612_vm15  ;;  %v2698_v2 = vcombine.low %v1684_v61, %v1680_v44  ;;  %v2700_v4 = vcombine.low %v1686_v0, %v1680_v44  ;;  %v1708_v7 = vshll.u32 %v3651_v63, 16 }
 0x1f6   : > { %1464 = vst.msk [vmem:[#allocation2 + $0x78] sm:$0xff] %vm1448_vm14, %v1435_v11  ;;  %v1433_v57 = vsel %vm1376_vm3, %v1304_v6, %v1405_v9  ;;  %v1706_v11 = vshrl.u32 %v3651_v63, 16  ;;  %vm1476_vm15 = vcmask 78848  }
 0x1f7   : > { %1462 = vst.msk [vmem:[#allocation2 + $0x68] sm:$0xff] %vm1448_vm14, %v1433_v57  ;;  %v1739_v9 = vrot.slane %v2698_v2, 1  ;;  %v1758_v57 = vshrl.u32 %v2700_v4, 16 }
 0x1fd   : > { %v1562_v15 = vld [vmem:[#allocation2 + $0x70] ss:$2 sm:$0x7f]  ;;  %v1564_v16 = vld [vmem:[#allocation2 + $0x71] ss:$2 sm:$0x7f] }
 0x1fe   : > { %v1565_v17 = vmax.f32 %v1562_v15, %v1564_v16  ;;  %v1557_v18 = vld [vmem:[#allocation2 + $0x60] ss:$2 sm:$0x7f]  ;;  %v1559_v19 = vld [vmem:[#allocation2 + $0x61] ss:$2 sm:$0x7f] }
 0x1ff   : > { %v1560_v14 = vmax.f32 %v1557_v18, %v1559_v19  ;;  %v1761_v19 = vshll.u32 %v2700_v4, 16 }
 0x201   : > { %v1566_v20 = vmax.f32 %v1560_v14, %v1565_v17 }
 0x203   : > { %v2764_v22 = vpack.c.bf16 %v1566_v20, %v1566_v20 }
 0x205   : > { %v1572_v23 = vshrl.u32 %v2764_v22, 16  ;;  %v1575_v21 = vshll.u32 %v2764_v22, 16 }
 0x207   : > { %v1574_v24 = vrot.slane %v1572_v23, 5  ;;  %v1577_v45 = vrot.slane %v1575_v21, 6 }
 0x209   : > { %v1578_v25 = vor.u32 %v1577_v45, %v1574_v24  ;;  %v1710_v24 = vrot.slane %v1708_v7, 1  ;;  %v1689_v7 = vld [vmem:[#allocation3 + $0x4] sm:$0x8] }
 0x20b   : > { %v1586_v10 = vsel %vm1584_vm6, %v1578_v25, %v1585_v26  ;;  %v1579_v27 = vrot.slane %v1578_v25, 4 }
 0x20c   : > { %1587 = vst [vmem:[#allocation3 + $0x8] sm:$0xc] %v1586_v10 }
 0x20d   : > { %1589 = vst.msk [vmem:[#allocation3 + $0xc] sm:$0x3] %vm1588_vm7, %v1579_v27  ;;  %vm1756_vm7 = vsmask.f32 4352 }
 0x20e   : > { %v2827_v28 = vpop.f32.mrb[16].mxu0 }
 0x20f   : > { %v1325_v30 = vadd.f32 %v2827_v28, %v3572_v5  ;;  %v1316_v29 = vpop.f32.mrb[17].mxu0 }
 0x210   : > { %v1317_v31 = vadd.f32 %v3572_v5, %v1316_v29  ;;  %v2828_v32 = vpop.f32.mrb[18].mxu0 }
 0x211   : > { %vm1381_vm9 = vcmp.ge.f32.partialorder %v1325_v30, 0.0  ;;  %v1410_v33 = vmul.f32 %v3574_v36, %v1325_v30  ;;  %v1328_v34 = vadd.f32 %v2828_v32, %v3572_v5  ;;  %v1319_v38 = vpop.f32.mrb[19].mxu0  ;;  %v1760_v32 = vrot.slane %v1758_v57, 3 }
 0x212   : > { %vm1379_vm10 = vcmp.ge.f32.partialorder %v1317_v31, 0.0  ;;  %v1408_v40 = vmul.f32 %v3574_v36, %v1317_v31  ;;  %v1320_v41 = vadd.f32 %v3572_v5, %v1319_v38  ;;  %v2947_v38 = vld [vmem:[%s3968_s3] sm:$0xff]  }
 0x213   : > { %v1438_v42 = vsel %vm1381_vm9, %v1325_v30, %v1410_v33  ;;  %vm1382_vm11 = vcmp.ge.f32.partialorder %v1328_v34, 0.0  ;;  %v1411_v43 = vmul.f32 %v3574_v36, %v1328_v34  ;;  %v3637_v35 = vld [vmem:[#allocation3 + $0x8] sm:$0xf]  ;;  %v1763_v33 = vrot.slane %v1761_v19, 4 }
 0x214   : > { %1467 = vst.msk [vmem:[#allocation2 + $0x90] sm:$0xff] %vm1448_vm14, %v1438_v42  ;;  %v1436_v46 = vsel %vm1379_vm10, %v1317_v31, %v1408_v40  ;;  %vm1380_vm12 = vcmp.ge.f32.partialorder %v1320_v41, 0.0  ;;  %v1409_v47 = vmul.f32 %v3574_v36, %v1320_v41  ;;  %v3642_v49 = vcombine.low %v1680_v44, %v3637_v35 }
 0x215   : > { %1465 = vst.msk [vmem:[#allocation2 + $0x80] sm:$0xff] %vm1448_vm14, %v1436_v46  ;;  %v1439_v50 = vsel %vm1382_vm11, %v1328_v34, %v1411_v43  ;;  %v3029_v34 = vmov 0.0   ;;  %v1711_v40 = vor.u32 %v1710_v24, %v1706_v11  ;;  %v2948_v46 = vld [vmem:[%s3968_s3 + $0x8] sm:$0xff]   ;;  %vm1643_vm9 = vcmask 76801   ;;  %v2951_v11 = vld [vmem:[%s3968_s3 + $0x20] sm:$0xff]  }
 0x216   : > { %1468 = vst.msk [vmem:[#allocation2 + $0x98] sm:$0xff] %vm1448_vm14, %v1439_v50  ;;  %v1437_v51 = vsel %vm1380_vm12, %v1320_v41, %v1409_v47  ;;  %1789 = vrot.lane.b32.xlu1 %v3642_v49, %s3027_s27  ;;  %2837 = vmatprep.subr.bf16.mxu1 %v3029_v34  ;;  %vm1644_vm10 = vsmask.f32 7942  ;;  %vm1649_vm12 = vcmask 73728  }
 0x217   : > { %1466 = vst.msk [vmem:[#allocation2 + $0x88] sm:$0xff] %vm1448_vm14, %v1437_v51  ;;  %2838 = vmatpush3.bf16.msra.mxu1 %v2947_v38  ;;  %v1764_v51 = vor.u32 %v1763_v33, %v1760_v32  ;;  %vm1645_vm11 = vmand %vm1643_vm9, %vm1644_vm10  ;;  %vm1673_vm10 = vsmask.f32 256 }
 0x218   : > { %2839 = vmatprep.subr.bf16.mxu1 %v3029_v34 }
 0x21b   : > { %2840 = vmatpush3.bf16.msra.mxu1 %v2948_v46 }
 0x21c   : > { %2841 = vmatprep.subr.bf16.mxu1 %v3029_v34 }
 0x21d   : > { %v1596_v52 = vld [vmem:[#allocation2 + $0x90] ss:$2 sm:$0x7f]  ;;  %v1598_v54 = vld [vmem:[#allocation2 + $0x91] ss:$2 sm:$0x7f] }
 0x21e   : > { %v1599_v1 = vmax.f32 %v1596_v52, %v1598_v54  ;;  %v1591_v55 = vld [vmem:[#allocation2 + $0x80] ss:$2 sm:$0x7f]  ;;  %v1593_v56 = vld [vmem:[#allocation2 + $0x81] ss:$2 sm:$0x7f] }
 0x21f   : > { %v1594_v58 = vmax.f32 %v1591_v55, %v1593_v56  ;;  %v2949_v54 = vld [vmem:[%s3968_s3 + $0x10] sm:$0xff]  }
 0x220   : > { %2842 = vmatpush3.bf16.msra.mxu1 %v2949_v54 }
 0x221   : > { %v1600_v37 = vmax.f32 %v1594_v58, %v1599_v1  ;;  %2843 = vmatprep.subr.bf16.mxu1 %v3029_v34 }
 0x223   : > { %v2765_v53 = vpack.c.bf16 %v1600_v37, %v1600_v37 }
 0x225   : > { %v1605_v59 = vrot.slane %v2765_v53, 6 }
 0x227   : > { %v1606_v12 = vrot.slane %v1605_v59, 4  ;;  %1610 = vst.msk [vmem:[#allocation3 + $0xc] sm:$0xc] %vm1582_vm4, %v1605_v59 }
 0x229   : > { %v1615_v39 = vsel %vm1613_vm13, %v1606_v12, %v1614_v60 }
 0x22a   : > { %1616 = vst [vmem:[#allocation3 + $0x10] sm:$0x3] %v1615_v39 }
 0x22b   : > { %v2831_v48 = vpop.f32.mrb[20].mxu0 }
 0x22c   : > { %v1341_v13 = vadd.f32 %v2831_v48, %v3572_v5  ;;  %v1332_v6 = vpop.f32.mrb[21].mxu0  ;;  %v2950_v48 = vld [vmem:[%s3968_s3 + $0x18] sm:$0xff]  }
 0x22d   : > { %v1333_v3 = vadd.f32 %v3572_v5, %v1332_v6  ;;  %v2832_v8 = vpop.f32.mrb[22].mxu0  ;;  %2844 = vmatpush3.bf16.msra.mxu1 %v2950_v48 }
 0x22e   : > { %vm1385_vm3 = vcmp.ge.f32.partialorder %v1341_v13, 0.0  ;;  %v1414_v15 = vmul.f32 %v3574_v36, %v1341_v13  ;;  %v1344_v16 = vadd.f32 %v2832_v8, %v3572_v5  ;;  %v1335_v17 = vpop.f32.mrb[23].mxu0  ;;  %v3659_v18 = vld [vmem:[#allocation3 + $0xc] sm:$0xf]  ;;  %2845 = vmatprep.subr.bf16.mxu1 %v3029_v34 }
 0x22f   : > { %vm1383_vm4 = vcmp.ge.f32.partialorder %v1333_v3, 0.0  ;;  %v1412_v14 = vmul.f32 %v3574_v36, %v1333_v3  ;;  %v1336_v20 = vadd.f32 %v3572_v5, %v1335_v17  ;;  %v3665_v22 = vcombine.low %v3637_v35, %v3659_v18 }
 0x230   : > { %v1442_v23 = vsel %vm1385_vm3, %v1341_v13, %v1414_v15  ;;  %vm1386_vm5 = vcmp.ge.f32.partialorder %v1344_v16, 0.0  ;;  %v1415_v21 = vmul.f32 %v3574_v36, %v1344_v16  ;;  %v1798_v15 = vshll.u32 %v3642_v49, 16 }
 0x231   : > { %1471 = vst.msk [vmem:[#allocation2 + $0xb0] sm:$0xff] %vm1448_vm14, %v1442_v23  ;;  %v1440_v45 = vsel %vm1383_vm4, %v1333_v3, %v1412_v14  ;;  %vm1384_vm6 = vcmp.ge.f32.partialorder %v1336_v20, 0.0  ;;  %v1413_v25 = vmul.f32 %v3574_v36, %v1336_v20  ;;  %1872 = vrot.lane.b32.xlu1 %v3665_v22, %s3028_s28  ;;  %v1740_v26 = vrot.slane %v3665_v22, 1  ;;  %v3676_v30 = vld [vmem:[#allocation3 + $0x10] ss:$0 sps:$4 sm:$0x11]   ;;  %2846 = vmatpush3.bf16.msra.mxu1 %v2951_v11 }
 0x232   : > { %1469 = vst.msk [vmem:[#allocation2 + $0xa0] sm:$0xff] %vm1448_vm14, %v1440_v45  ;;  %v1443_v10 = vsel %vm1386_vm5, %v1344_v16, %v1415_v21  ;;  %v1713_v27 = vshll.u32 %v3665_v22, 16  ;;  %v1717_v28 = vshrl.u32 %v3665_v22, 16  ;;  %v1721_v44 = vshll.u32 %v3676_v30, 16  ;;  %v1646_v6 = vld [vmem:[#allocation3 + $0x10] sm:$0xe]  ;;  %2847 = vmatprep.subr.bf16.mxu1 %v3029_v34 }
 0x233   : > { %1472 = vst.msk [vmem:[#allocation2 + $0xb8] sm:$0xff] %vm1448_vm14, %v1443_v10  ;;  %v1441_v29 = vsel %vm1384_vm6, %v1336_v20, %v1413_v25  ;;  %v1741_v31 = vsel %vm657_vm0, %v1739_v9, %v1740_v26  ;;  %v2705_v9 = vcombine.low %v1689_v7, %v3637_v35  ;;  %v1796_v35 = vshrl.u32 %v3642_v49, 16  ;;  %v2952_v25 = vld [vmem:[%s3968_s3 + $0x28] sm:$0x1f]  }
 0x234   : > { %1470 = vst.msk [vmem:[#allocation2 + $0xa8] sm:$0xff] %vm1448_vm14, %v1441_v29  ;;  %v1715_v41 = vrot.slane %v1713_v27, 1  ;;  %v1765_v42 = vrot.slane %v1717_v28, 3  ;;  %v1766_v43 = vrot.slane %v1713_v27, 4  ;;  %v1723_v52 = vrot.slane %v1721_v44, 1 }
 0x235   : > { %1744 = vrot.lane.b32.xlu1 %v1741_v31, %s3030_s12  ;;  %v1842_v20 = vshrl.u32 %v2705_v9, 16  ;;  %v1845_v45 = vshll.u32 %v2705_v9, 16  ;;  %v1995_v32 = vsel %vm1211_vm2, %v2952_v25, 0  ;;  %vm3033_vm6 = vmmov 0  }
 0x236   : > { %v1716_v47 = vsel %vm514_vm1, %v1711_v40, %v1715_v41  ;;  %v3693_v50 = vor.u32 %v1766_v43, %v1765_v42  ;;  %v1719_v58 = vor.u32 %v1717_v28, %v1715_v41  ;;  %v1800_v28 = vrot.slane %v1798_v15, 1  ;;  %2848 = vmatpush3.bf16.msra.mxu1 %v1995_v32  ;;  %v3742_v43 = vld [vmem:[#allocation3 + $0x10] ss:$0 sps:$4 sm:$0x33]   ;;  %2849 = vmatprep.mubr.msk.bf16.mxu1 %vm3033_vm6, %v3029_v34 }
 0x237   : > { %1727 = vrot.lane.b32.xlu0 %v1716_v47, %s3031_s15  ;;  %v1830_v42 = vrot.slane %v2705_v9, 3  ;;  %v1844_v46 = vrot.slane %v1842_v20, 3  ;;  %v1725_v32 = vshrl.u32 %v3676_v30, 16 }
 0x238   : > { %v1768_v56 = vsel %vm1756_vm7, %v1764_v51, %v3693_v50  ;;  %v1724_v62 = vsel %vm514_vm1, %v1719_v58, %v1723_v52  ;;  %v1847_v51 = vrot.slane %v1845_v45, 4 }
 0x23a   : > { %v1623_v1 = vld [vmem:[#allocation2 + $0xb0] ss:$2 sm:$0x7f]  ;;  %v1625_v55 = vld [vmem:[#allocation2 + $0xb1] ss:$2 sm:$0x7f] }
 0x23b   : > { %v1626_v37 = vmax.f32 %v1623_v1, %v1625_v55  ;;  %v1618_v53 = vld [vmem:[#allocation2 + $0xa0] ss:$2 sm:$0x7f]  ;;  %v1620_v59 = vld [vmem:[#allocation2 + $0xa1] ss:$2 sm:$0x7f]  ;;  %1778 = vrot.lane.b32.xlu0 %v1768_v56, %s3032_s20  ;;  %v1801_v55 = vor.u32 %v1800_v28, %v1796_v35 }
 0x23c   : > { %v1621_v60 = vmax.f32 %v1618_v53, %v1620_v59 }
 0x23e   : > { %v1627_v12 = vmax.f32 %v1621_v60, %v1626_v37  ;;  %v1742_v37 = vrot.slane %v3742_v43, 1 }
 0x23f   : > { %1729 = vrot.lane.b32.xlu0 %v1724_v62, %s3031_s15 }
 0x240   : > { %v2766_v61 = vpack.c.bf16 %v1627_v12, %v1627_v12 }
 0x242   : > { %v1633_v0 = vshrl.u32 %v2766_v61, 16  ;;  %v1636_v2 = vshll.u32 %v2766_v61, 16  ;;  %v1848_v61 = vor.u32 %v1847_v51, %v1844_v46 }
 0x244   : > { %v1635_v4 = vrot.slane %v1633_v0, 6  ;;  %v1638_v39 = vrot.slane %v1636_v2, 7 }
 0x246   : > { %v1639_v13 = vor.u32 %v1638_v39, %v1635_v4  ;;  %v1743_v39 = vsel %vm657_vm0, %v1740_v26, %v1742_v37 }
 0x248   : > { %v1647_v3 = vsel %vm1645_vm11, %v1639_v13, %v1646_v6  ;;  %v1640_v8 = vrot.slane %v1639_v13, 4  ;;  %vm1674_vm11 = vmand %vm1649_vm12, %vm1673_vm10 }
 0x249   : > { %1648 = vst [vmem:[#allocation3 + $0x10] sm:$0xe] %v1647_v3 }
 0x24a   : > { %1650 = vst.msk [vmem:[#allocation3 + $0x14] sm:$0x1] %vm1649_vm12, %v1640_v8  ;;  %vm1891_vm12 = vcmask 244736  }
 0x24b   : > { %v2835_v57 = vpop.f32.mrb[24].mxu0 }
 0x24c   : > { %v1357_v16 = vadd.f32 %v2835_v57, %v3572_v5  ;;  %v1348_v17 = vpop.f32.mrb[25].mxu0 }
 0x24d   : > { %v1349_v19 = vadd.f32 %v3572_v5, %v1348_v17  ;;  %v2836_v14 = vpop.f32.mrb[26].mxu0 }
 0x24e   : > { %vm1389_vm13 = vcmp.ge.f32.partialorder %v1357_v16, 0.0  ;;  %v1418_v23 = vmul.f32 %v3574_v36, %v1357_v16  ;;  %v1360_v21 = vadd.f32 %v2836_v14, %v3572_v5  ;;  %v1351_v24 = vpop.f32.mrb[27].mxu0  ;;  %v1675_v14 = vld [vmem:[#allocation3 + $0x18] sm:$0x1] }
 0x24f   : > { %vm1387_vm3 = vcmp.ge.f32.partialorder %v1349_v19, 0.0  ;;  %v1416_v10 = vmul.f32 %v3574_v36, %v1349_v19  ;;  %v1352_v27 = vadd.f32 %v3572_v5, %v1351_v24 }
 0x250   : > { %v1446_v29 = vsel %vm1389_vm13, %v1357_v16, %v1418_v23  ;;  %vm1390_vm4 = vcmp.ge.f32.partialorder %v1360_v21, 0.0  ;;  %v1419_v49 = vmul.f32 %v3574_v36, %v1360_v21  ;;  %v3730_v31 = vld [vmem:[#allocation3 + $0x10] sm:$0xf]  ;;  %vm1905_vm13 = vcmask 408576  }
 0x251   : > { %1475 = vst.msk [vmem:[#allocation2 + $0xd0] sm:$0xff] %vm1448_vm14, %v1446_v29  ;;  %v1444_v33 = vsel %vm1387_vm3, %v1349_v19, %v1416_v10  ;;  %vm1388_vm5 = vcmp.ge.f32.partialorder %v1352_v27, 0.0  ;;  %v1417_v38 = vmul.f32 %v3574_v36, %v1352_v27  ;;  %v3737_v40 = vcombine.low %v3659_v18, %v3730_v31  ;;  %v2944_v0 = vld [vmem:[#allocation3 + $0x14] ss:$0 sps:$4 sm:$0x11]  }
 0x252   : > { %1473 = vst.msk [vmem:[#allocation2 + $0xc0] sm:$0xff] %vm1448_vm14, %v1444_v33  ;;  %v1447_v5 = vsel %vm1390_vm4, %v1360_v21, %v1419_v49  ;;  %v2701_v41 = vcombine.low %v3730_v31, %v3730_v31  ;;  %v1811_v9 = vshll.u32 %v2944_v0, 16  ;;  %v1815_v33 = vshrl.u32 %v2944_v0, 16 }
 0x253   : > { %1477 = vst.msk [vmem:[#allocation2 + $0xd8] sm:$0x3f] %vm1476_vm15, %v1447_v5  ;;  %v1445_v44 = vsel %vm1388_vm5, %v1352_v27, %v1417_v38  ;;  %1791 = vrot.lane.b32.xlu1 %v3737_v40, %s3027_s27  ;;  %v1831_v36 = vrot.slane %v3737_v40, 3  ;;  %v1803_v18 = vshll.u32 %v3737_v40, 16  ;;  %v1807_v47 = vshrl.u32 %v3737_v40, 16 }
 0x254   : > { %1474 = vst.msk [vmem:[#allocation2 + $0xc8] sm:$0xff] %vm1448_vm14, %v1445_v44  ;;  %v1770_v52 = vshrl.u32 %v2701_v41, 16  ;;  %v1773_v54 = vshll.u32 %v2701_v41, 16  ;;  %v1813_v26 = vrot.slane %v1811_v9, 1  ;;  %vm1898_vm15 = vcmask 326656  }
 0x255   : > { %v1832_v1 = vsel %vm1211_vm2, %v1830_v42, %v1831_v36  ;;  %v1805_v56 = vrot.slane %v1803_v18, 1  ;;  %v1850_v58 = vrot.slane %v1803_v18, 4  ;;  %v1849_v53 = vrot.slane %v1807_v47, 3 }
 0x256   : > { %v1772_v60 = vrot.slane %v1770_v52, 3  ;;  %v1775_v12 = vrot.slane %v1773_v54, 4  ;;  %vm1912_vm3 = vcmask 490496   ;;  %vm1919_vm4 = vcmask 572416  }
 0x257   : > { %1835 = vrot.lane.b32.xlu1 %v1832_v1, %s3034_s29  ;;  %v1806_v59 = vsel %vm514_vm1, %v1801_v55, %v1805_v56  ;;  %v1851_v62 = vor.u32 %v1850_v58, %v1849_v53  ;;  %v1809_v15 = vor.u32 %v1807_v47, %v1805_v56  ;;  %vm1926_vm5 = vcmask 654336  }
 0x258   : > { %1817 = vrot.lane.b32.xlu0 %v1806_v59, %s3035_s30  ;;  %v1776_v3 = vor.u32 %v1775_v12, %v1772_v60 }
 0x259   : > { %v1852_v7 = vsel %vm1756_vm7, %v1848_v61, %v1851_v62  ;;  %v1814_v19 = vsel %vm514_vm1, %v1809_v15, %v1813_v26 }
 0x25a   : > { %v1657_v2 = vld [vmem:[#allocation2 + $0xd0] ss:$2 sm:$0x7f]  ;;  %v1659_v4 = vld [vmem:[#allocation2 + $0xd1] ss:$2 sm:$0x7f]  ;;  %v1777_v57 = vsel %vm1756_vm7, %v3693_v50, %v1776_v3 }
 0x25b   : > { %v1660_v48 = vmax.f32 %v1657_v2, %v1659_v4  ;;  %v1652_v13 = vld [vmem:[#allocation2 + $0xc0] ss:$2 sm:$0x7f]  ;;  %v1654_v6 = vld [vmem:[#allocation2 + $0xc1] ss:$2 sm:$0x7f]  ;;  %1746 = vrot.lane.b32.xlu1 %v1743_v39, %s3030_s12 }
 0x25c   : > { %v1655_v8 = vmax.f32 %v1652_v13, %v1654_v6  ;;  %1862 = vrot.lane.b32.xlu0 %v1852_v7, %s3036_s13 }
 0x25e   : > { %v1661_v11 = vmax.f32 %v1655_v8, %v1660_v48 }
 0x260   : > { %v2767_v16 = vpack.c.bf16 %v1661_v11, %v1661_v11  ;;  %1780 = vrot.lane.b32.xlu0 %v1777_v57, %s3032_s20 }
 0x262   : > { %v1666_v17 = vrot.slane %v2767_v16, 7 }
 0x264   : > { %v1667_v35 = vrot.slane %v1666_v17, 4  ;;  %1671 = vst.msk [vmem:[#allocation3 + $0x14] sm:$0xe] %vm1643_vm9, %v1666_v17  ;;  %1819 = vrot.lane.b32.xlu0 %v1814_v19, %s3035_s30  ;;  %vm1884_vm9 = vcmask 162816  }
 0x266   : > { %v1676_v20 = vsel %vm1674_vm11, %v1667_v35, %v1675_v14  ;;  %vm1987_vm11 = vcmask 736256   ;;  %v2964_v35 = vld [vmem:[%s3970_s5] sm:$0xff]  }
 0x267   : > { %1677 = vst [vmem:[#allocation3 + $0x18] sm:$0x1] %v1676_v20  ;;  %v3037_v20 = vmov 0  }
 0x268   : > { %2363 = vmatprep.subr.bf16.mxu1 %v3037_v20 }
 0x26b   : > { %v1690_v50 = vld [vmem:[#allocation3 + $0x14] sm:$0xf] }
 0x26c   : > { %v2706_v23 = vcombine.low %v1690_v50, %v1690_v50  ;;  %v2707_v29 = vcombine.low %v3730_v31, %v1690_v50  ;;  %v2965_v50 = vld [vmem:[%s3970_s5 + $0x8] sm:$0xff]  }
 0x26e   : > { %v1833_v21 = vrot.slane %v2706_v23, 3  ;;  %v1854_v24 = vshrl.u32 %v2706_v23, 16  ;;  %v1857_v45 = vshll.u32 %v2706_v23, 16  ;;  %v2946_v31 = vld [vmem:[#allocation3 + $0x18] ss:$0 sps:$4 sm:$0x11]  }
 0x26f   : > { %v2966_v23 = vld [vmem:[%s3970_s5 + $0x10] sm:$0xff]  }
 0x270   : > { %v1834_v25 = vsel %vm1211_vm2, %v1831_v36, %v1833_v21  ;;  %v1856_v10 = vrot.slane %v1854_v24, 3  ;;  %v1859_v27 = vrot.slane %v1857_v45, 4  ;;  %v3841_v24 = vld [vmem:[%s3969_s4] ss:$0 sm:$0xff] }
 0x271   : > { %1837 = vrot.lane.b32.xlu1 %v1834_v25, %s3034_s29  ;;  %v3843_v25 = vstv %s2694_s22  ;;  %s3041_s22 = smov 48  }
 0x272   : > { %v1860_v28 = vor.u32 %v1859_v27, %v1856_v10 }
 0x274   : > { %v1861_v49 = vsel %vm1756_vm7, %v1851_v62, %v1860_v28 }
 0x275   : > { %1864 = vrot.lane.b32.xlu0 %v1861_v49, %s3036_s13  ;;  %1874 = vrot.lane.b32.xlu1 %v2707_v29, %s3028_s28 }
 0x279   : > { %1731 = vrot.lane.b32.xlu0 %v1725_v32, %s3031_s15  ;;  %1748 = vrot.lane.b32.xlu1 %v1742_v37, %s3030_s12  ;;  %s3038_s15 = smov 64  }
 0x27d   : > { %1782 = vrot.lane.b32.xlu0 %v1772_v60, %s3032_s20  ;;  %1793 = vrot.lane.b32.xlu1 %v2944_v0, %s3027_s27 }
 0x281   : > { %1821 = vrot.lane.b32.xlu0 %v1815_v33, %s3035_s30  ;;  %1839 = vrot.lane.b32.xlu1 %v1833_v21, %s3034_s29  ;;  %v2967_v21 = vld [vmem:[%s3970_s5 + $0x18] sm:$0xff]   ;;  %s3043_s30 = smov 112  }
 0x285   : > { %1866 = vrot.lane.b32.xlu0 %v1856_v10, %s3036_s13  ;;  %1876 = vrot.lane.b32.xlu1 %v2946_v31, %s3028_s28 }
 0x288   : > { %v1790_v38 = vpop.permute.xlu1 %1789 }
 0x2a3   : > { %v1873_v5 = vpop.permute.xlu1 %1872 }
 0x2a7   : > { %v1745_v42 = vpop.permute.xlu1 %1744 }
 0x2a9   : > { %v1728_v40 = vpop.permute.xlu0 %1727 }
 0x2aa   : > { %v1879_v43 = vsel %vm1448_vm14, %v3651_v63, %v1728_v40 }
 0x2ab   : > { %v1886_v44 = vsel %vm1884_vm9, %v1879_v43, %v1745_v42 }
 0x2ad   : > { %v1779_v41 = vpop.permute.xlu0 %1778 }
 0x2ae   : > { %v1893_v18 = vsel %vm1891_vm12, %v1886_v44, %v1779_v41 }
 0x2af   : > { %v1900_v47 = vsel %vm1898_vm15, %v1893_v18, %v1790_v38 }
 0x2b1   : > { %v1730_v36 = vpop.permute.xlu0 %1729 }
 0x2b2   : > { %v1881_v53 = vsel %vm1448_vm14, %v3665_v22, %v1730_v36 }
 0x2c5   : > { %v1792_v46 = vpop.permute.xlu1 %1791 }
 0x2c9   : > { %v1836_v54 = vpop.permute.xlu1 %1835 }
 0x2ca   : > { %v1818_v51 = vpop.permute.xlu0 %1817 }
 0x2cb   : > { %v1907_v52 = vsel %vm1905_vm13, %v1900_v47, %v1818_v51  ;;  %v2968_v51 = vld [vmem:[%s3970_s5 + $0x20] sm:$0xff]  }
 0x2cc   : > { %v1914_v63 = vsel %vm1912_vm3, %v1907_v52, %v1836_v54 }
 0x2cd   : > { %v1747_v37 = vpop.permute.xlu1 %1746 }
 0x2ce   : > { %v1863_v1 = vpop.permute.xlu0 %1862  ;;  %v1888_v59 = vsel %vm1884_vm9, %v1881_v53, %v1747_v37 }
 0x2cf   : > { %v1921_v55 = vsel %vm1919_vm4, %v1914_v63, %v1863_v1 }
 0x2d0   : > { %v1928_v56 = vsel %vm1926_vm5, %v1921_v55, %v1873_v5 }
 0x2d1   : > { %2850 = vmatmul.mubr.msk.bf16.vlgmr.msra.gmra.mrb[0].mxu1 %vm1987_vm11, %v1928_v56 }
 0x2d2   : > { %2853 = vmatprep.mubr.msk.bf16.mxu1 %vm3033_vm6, %v3029_v34  ;;  %v1781_v58 = vpop.permute.xlu0 %1780  ;;  %2364 = vmatpush1.bf16.msra.mxu1 %v2964_v35 }
 0x2d3   : > { %v1895_v60 = vsel %vm1891_vm12, %v1888_v59, %v1781_v58  ;;  %2365 = vmatprep.subr.bf16.mxu1 %v3037_v20 }
 0x2d4   : > { %v1902_v61 = vsel %vm1898_vm15, %v1895_v60, %v1792_v46  ;;  %v2969_v60 = vld [vmem:[%s3970_s5 + $0x28] sm:$0xff]  }
 0x2d6   : > { %v1820_v12 = vpop.permute.xlu0 %1819  ;;  %2366 = vmatpush1.bf16.msra.mxu1 %v2965_v50 }
 0x2d7   : > { %v1909_v0 = vsel %vm1905_vm13, %v1902_v61, %v1820_v12  ;;  %2367 = vmatprep.subr.bf16.mxu1 %v3037_v20 }
 0x2da   : > { %2368 = vmatpush1.bf16.msra.mxu1 %v2966_v23 }
 0x2db   : > { %2369 = vmatprep.subr.bf16.mxu1 %v3037_v20 }
 0x2de   : > { %2370 = vmatpush1.bf16.msra.mxu1 %v2967_v21 }
 0x2df   : > { %2371 = vmatprep.subr.bf16.mxu1 %v3037_v20 }
 0x2e2   : > { %2372 = vmatpush1.bf16.msra.mxu1 %v2968_v51 }
 0x2e3   : > { %v1838_v62 = vpop.permute.xlu1 %1837  ;;  %2373 = vmatprep.subr.bf16.mxu1 %v3037_v20 }
 0x2e4   : > { %v1916_v2 = vsel %vm1912_vm3, %v1909_v0, %v1838_v62  ;;  %v2970_v0 = vld [vmem:[%s3970_s5 + $0x30] sm:$0xff]  }
 0x2e6   : > { %2374 = vmatpush1.bf16.msra.mxu1 %v2969_v60 }
 0x2e7   : > { %v1875_v4 = vpop.permute.xlu1 %1874  ;;  %v1865_v39 = vpop.permute.xlu0 %1864  ;;  %2375 = vmatprep.subr.bf16.mxu1 %v3037_v20 }
 0x2e8   : > { %v1923_v48 = vsel %vm1919_vm4, %v1916_v2, %v1865_v39 }
 0x2e9   : > { %v1930_v13 = vsel %vm1926_vm5, %v1923_v48, %v1875_v4 }
 0x2ea   : > { %2854 = vmatmul.mubr.msk.bf16.gmra.mrb[4].mxu1 %vm1987_vm11, %v1930_v13 }
 0x2eb   : > { %v1749_v22 = vpop.permute.xlu1 %1748  ;;  %v1732_v6 = vpop.permute.xlu0 %1731  ;;  %2857 = vmatprep.mubr.msk.bf16.mxu1 %vm3033_vm6, %v3029_v34  ;;  %vm2090_vm6 = vcmask 125952   ;;  %2376 = vmatpush1.bf16.msra.mxu1 %v2970_v0 }
 0x2ec   : > { %v1883_v7 = vsel %vm1448_vm14, %v3676_v30, %v1732_v6  ;;  %2377 = vmatprep.subr.bf16.mxu1 %v3037_v20 }
 0x2ed   : > { %v1890_v8 = vsel %vm1884_vm9, %v1883_v7, %v1749_v22 }
 0x2ef   : > { %v1794_v3 = vpop.permute.xlu1 %1793  ;;  %v1783_v9 = vpop.permute.xlu0 %1782 }
 0x2f0   : > { %v1897_v11 = vsel %vm1891_vm12, %v1890_v8, %v1783_v9  ;;  %v2971_v9 = vld [vmem:[%s3970_s5 + $0x38] sm:$0xff]  }
 0x2f1   : > { %v1904_v15 = vsel %vm1898_vm15, %v1897_v11, %v1794_v3  ;;  %2378 = vmatpush1.bf16.msra.mxu1 %v2971_v9 }
 0x2f2   : > { %2379 = vmatprep.subr.bf16.mxu1 %v3037_v20 }
 0x2f3   : > { %v1840_v57 = vpop.permute.xlu1 %1839  ;;  %v1822_v16 = vpop.permute.xlu0 %1821 }
 0x2f4   : > { %v1911_v26 = vsel %vm1905_vm13, %v1904_v15, %v1822_v16  ;;  %vm2095_vm13 = vcmask 122880  }
 0x2f5   : > { %v1918_v19 = vsel %vm1912_vm3, %v1911_v26, %v1840_v57  ;;  %vm2242_vm3 = vcmask 130048  }
 0x2f7   : > { %v1877_v17 = vpop.permute.xlu1 %1876  ;;  %v1867_v14 = vpop.permute.xlu0 %1866 }
 0x2f8   : > { %v1925_v34 = vsel %vm1919_vm4, %v1918_v19, %v1867_v14 }
 0x2f9   : > { %v1932_v30 = vsel %vm1926_vm5, %v1925_v34, %v1877_v17 }
 0x2fa   : > { %2858 = vmatmul.mubr.msk.bf16.gmra.mrb[8].mxu1 %vm1987_vm11, %v1932_v30  ;;  %vm3892_vm11 = vmand %vm2095_vm13, %vm1673_vm10 }
 0x3a4   : > { %v2031_v45 = vpop.f32.mrb[0].mxu1 }
 0x3a5   : > { %v2032_v10 = vadd.f32 %v3841_v24, %v2031_v45  ;;  %v2851_v27 = vpop.f32.mrb[1].mxu1 }
 0x3a6   : > { %v2034_v28 = vpop.f32.mrb[2].mxu1 }
 0x3a7   : > { %vm2053_vm14 = vcmp.ge.f32.partialorder %v2032_v10, 0.0  ;;  %v2059_v29 = vmul.f32 %v3843_v25, %v2032_v10  ;;  %v2035_v49 = vadd.f32 %v3841_v24, %v2034_v28  ;;  %v2852_v32 = vpop.f32.mrb[3].mxu1 }
 0x3a9   : > { %v2064_v33 = vsel %vm2053_vm14, %v2032_v10, %v2059_v29  ;;  %vm2054_vm9 = vcmp.ge.f32.partialorder %v2035_v49, 0.0  ;;  %v2060_v31 = vmul.f32 %v3843_v25, %v2035_v49  ;;  %v2097_v29 = vld [vmem:[#allocation4 + $0x10] sm:$0x1]  ;;  %vm2271_vm14 = vcmask 916480  }
 0x3aa   : > { %v2768_v38 = vpack.c.bf16 %v2064_v33, %v2064_v33 }
 0x3ab   : > { %v2065_v40 = vsel %vm2054_vm9, %v2035_v49, %v2060_v31  ;;  %v2972_v31 = vld [vmem:[%s3970_s5 + $0x40] sm:$0xff]  }
 0x3ac   : > { %2091 = vst.msk [vmem:[#allocation4] sm:$0xf] %vm2090_vm6, %v2768_v38  ;;  %v2769_v5 = vpack.c.bf16 %v2065_v40, %v2065_v40  ;;  %2380 = vmatpush1.bf16.msra.mxu1 %v2972_v31 }
 0x3ae   : > { %2092 = vst.msk [vmem:[#allocation4 + $0x4] sm:$0xf] %vm2090_vm6, %v2769_v5 }
 0x3b3   : > { %v2101_v63 = vld [vmem:[#allocation4] sm:$0xf] }
 0x3b4   : > { %v2106_v58 = vld [vmem:[#allocation4] sm:$0x8] }
 0x3b5   : > { %v2102_v47 = vld [vmem:[#allocation4 + $0x4] sm:$0xf]  ;;  %v2104_v59 = vld [vmem:[#allocation4] sm:$0xe] }
 0x3b6   : > { %v3858_v55 = vcombine.low %v2101_v63, %v2102_v47  ;;  %v2729_v53 = vcombine.low %v2106_v58, %v2102_v47  ;;  %v2727_v62 = vcombine.low %v2104_v59, %v2102_v47  ;;  %v2109_v21 = vld [vmem:[#allocation4 + $0x4] sm:$0x8] }
 0x3b8   : > { %v2123_v12 = vshll.u32 %v3858_v55, 16  ;;  %v2158_v61 = vshrl.u32 %v2729_v53, 16  ;;  %v2121_v2 = vshrl.u32 %v3858_v55, 16  ;;  %v2144_v39 = vrot.slane %v2727_v62, 1 }
 0x3b9   : > { %v2161_v48 = vshll.u32 %v2729_v53, 16 }
 0x3ba   : > { %v2125_v4 = vrot.slane %v2123_v12, 1  ;;  %v2160_v8 = vrot.slane %v2158_v61, 3 }
 0x3bb   : > { %v2163_v14 = vrot.slane %v2161_v48, 4  ;;  %v2975_v48 = vld [vmem:[%s3972_s7 + $0x8] sm:$0xff]  }
 0x3bc   : > { %v2126_v49 = vor.u32 %v2125_v4, %v2121_v2 }
 0x3bd   : > { %v2039_v41 = vpop.f32.mrb[4].mxu1 }
 0x3be   : > { %v2040_v42 = vadd.f32 %v3841_v24, %v2039_v41  ;;  %v2855_v43 = vpop.f32.mrb[5].mxu1 }
 0x3bf   : > { %v2042_v44 = vpop.f32.mrb[6].mxu1 }
 0x3c0   : > { %vm2055_vm12 = vcmp.ge.f32.partialorder %v2040_v42, 0.0  ;;  %v2061_v36 = vmul.f32 %v3843_v25, %v2040_v42  ;;  %v2043_v18 = vadd.f32 %v3841_v24, %v2042_v44  ;;  %v2856_v46 = vpop.f32.mrb[7].mxu1  ;;  %v2164_v44 = vor.u32 %v2163_v14, %v2160_v8 }
 0x3c2   : > { %v2066_v52 = vsel %vm2055_vm12, %v2040_v42, %v2061_v36  ;;  %vm2056_vm15 = vcmp.ge.f32.partialorder %v2043_v18, 0.0  ;;  %v2062_v54 = vmul.f32 %v3843_v25, %v2043_v18  ;;  %vm2437_vm12 = vcmask 253952  }
 0x3c3   : > { %v2770_v1 = vpack.c.bf16 %v2066_v52, %v2066_v52  ;;  %vm2438_vm13 = vmand %vm2437_vm12, %vm1673_vm10 }
 0x3c4   : > { %v2067_v56 = vsel %vm2056_vm15, %v2043_v18, %v2062_v54 }
 0x3c5   : > { %2093 = vst.msk [vmem:[#allocation4 + $0x8] sm:$0xf] %vm2090_vm6, %v2770_v1  ;;  %v2771_v37 = vpack.c.bf16 %v2067_v56, %v2067_v56 }
 0x3c7   : > { %2094 = vst.msk [vmem:[#allocation4 + $0xc] sm:$0xf] %vm2090_vm6, %v2771_v37 }
 0x3cc   : > { %v2107_v13 = vld [vmem:[#allocation4 + $0x8] sm:$0xf] }
 0x3cd   : > { %v2047_v22 = vpop.f32.mrb[8].mxu1  ;;  %v3872_v6 = vcombine.low %v2102_v47, %v2107_v13  ;;  %v2954_v7 = vld [vmem:[#allocation4 + $0x8] ss:$0 sps:$4 sm:$0x33]   ;;  %v2730_v3 = vcombine.low %v2107_v13, %v2107_v13  ;;  %v2733_v33 = vcombine.low %v2109_v21, %v2107_v13 }
 0x3ce   : > { %v2048_v11 = vadd.f32 %v3841_v24, %v2047_v22  ;;  %v2859_v57 = vpop.f32.mrb[9].mxu1  ;;  %v2110_v15 = vld [vmem:[#allocation4 + $0xc] sm:$0xf]  ;;  %v3879_v16 = vld [vmem:[#allocation4 + $0x8] ss:$0 sps:$4 sm:$0x11]  }
 0x3cf   : > { %2182 = vrot.lane.b32.xlu1 %v3872_v6, %s3038_s15  ;;  %v2050_v26 = vpop.f32.mrb[10].mxu1  ;;  %v2145_v17 = vrot.slane %v2954_v7, 1  ;;  %v2735_v19 = vcombine.low %v2107_v13, %v2110_v15  ;;  %v2166_v34 = vshrl.u32 %v2730_v3, 16  ;;  %v3884_v50 = vcombine.low %v2110_v15, %v2110_v15  ;;  %v2963_v27 = vld [vmem:[#allocation4 + $0xc] ss:$0 sps:$4 sm:$0x11]  }
 0x3d0   : > { %vm2057_vm4 = vcmp.ge.f32.partialorder %v2048_v11, 0.0  ;;  %v2063_v30 = vmul.f32 %v3843_v25, %v2048_v11  ;;  %v2860_v35 = vpop.f32.mrb[11].mxu1  ;;  %v2128_v23 = vshll.u32 %v3879_v16, 16  ;;  %v2132_v24 = vshrl.u32 %v3879_v16, 16 }
 0x3d1   : > { %2149 = vrot.lane.b32.xlu0 %v2145_v17, %s3039_s16  ;;  %2747 = vmatprep.mubr.msk.bf16.mxu1 %vm2242_vm3, %v2735_v19  ;;  %v2168_v45 = vrot.slane %v2166_v34, 3  ;;  %v2169_v10 = vshll.u32 %v2730_v3, 16  ;;  %v2189_v5 = vshll.u32 %v3872_v6, 16  ;;  %v2194_v41 = vshll.u32 %v2963_v27, 16 }
 0x3d2   : > { %v2068_v28 = vsel %vm2057_vm4, %v2048_v11, %v2063_v30  ;;  %v2130_v32 = vrot.slane %v2128_v23, 1  ;;  %v2146_v43 = vsel %vm657_vm0, %v2144_v39, %v2145_v17  ;;  %v2211_v36 = vrot.slane %v3884_v50, 3  ;;  %v2974_v39 = vld [vmem:[%s3972_s7] sm:$0xff]  }
 0x3d3   : > { %v2772_v38 = vpack.c.bf16 %v2068_v28, %v2068_v28  ;;  %2136 = vrot.lane.b32.xlu1 %v2132_v24, %s3040_s21  ;;  %v2171_v40 = vrot.slane %v2169_v10, 4  ;;  %v2187_v47 = vshrl.u32 %v3872_v6, 16  ;;  %v2191_v51 = vrot.slane %v2189_v5, 1  ;;  %2861 = vmatprep.subr.bf16.mxu0 %v2974_v39 }
 0x3d4   : > { %v2131_v42 = vsel %vm514_vm1, %v2126_v49, %v2130_v32  ;;  %v2218_v52 = vshrl.u32 %v2733_v33, 16  ;;  %v2221_v54 = vshll.u32 %v2733_v33, 16  ;;  %v2226_v63 = vshrl.u32 %v3884_v50, 16  ;;  %2862 = vmatpush3.bf16.msra.mxu0 %v2974_v39 }
 0x3d5   : > { %v2098_v18 = vsel %vm3892_vm11, %v2772_v38, %v2097_v29  ;;  %2134 = vrot.lane.b32.xlu0 %v2131_v42, %s3040_s21  ;;  %v2172_v46 = vor.u32 %v2171_v40, %v2168_v45  ;;  %v2229_v1 = vshll.u32 %v3884_v50, 16  ;;  %v2210_v56 = vrot.slane %v2733_v33, 3  ;;  %2863 = vmatprep.subr.bf16.mxu0 %v2975_v48  ;;  %v2737_v33 = vld [vmem:[%s3971_s6] ss:$0 sm:$0xff] }
 0x3d6   : > { %2099 = vst [vmem:[#allocation4 + $0x10] sm:$0x1] %v2098_v18  ;;  %v2196_v58 = vrot.slane %v2194_v41, 1  ;;  %v2192_v53 = vor.u32 %v2191_v51, %v2187_v47  ;;  %v2228_v59 = vrot.slane %v2226_v63, 3  ;;  %v2220_v62 = vrot.slane %v2218_v52, 3 }
 0x3d7   : > { %2147 = vrot.lane.b32.xlu1 %v2146_v43, %s3039_s16  ;;  %v2173_v37 = vsel %vm1756_vm7, %v2164_v44, %v2172_v46  ;;  %v2231_v60 = vrot.slane %v2229_v1, 4  ;;  %v2212_v12 = vsel %vm1211_vm2, %v2210_v56, %v2211_v36  ;;  %v2223_v61 = vrot.slane %v2221_v54, 4 }
 0x3d8   : > { %v2197_v0 = vsel %vm514_vm1, %v2192_v53, %v2196_v58  ;;  %v2198_v22 = vshrl.u32 %v2963_v27, 16  ;;  %2864 = vmatpush3.bf16.msra.mxu0 %v2975_v48  ;;  %vm2247_vm0 = vcmask 261120   ;;  %vm2252_vm1 = vcmask 392192   ;;  %v2439_v53 = vld [vmem:[#allocation5 + $0x8] sm:$0x1] }
 0x3d9   : > { %2174 = vrot.lane.b32.xlu0 %v2173_v37, %s3041_s22  ;;  %v2232_v2 = vor.u32 %v2231_v60, %v2228_v59  ;;  %v2224_v4 = vor.u32 %v2223_v61, %v2220_v62  ;;  %vm2257_vm2 = vcmask 523264   ;;  %v2752_v61 = vld [vmem:[%s3973_s8] ss:$0 sm:$0xff]  ;;  %vm2570_vm11 = vcmask 114688  }
 0x3db   : > { %2213 = vrot.lane.b32.xlu1 %v2212_v12, %s3042_s23  ;;  %v2233_v13 = vsel %vm1756_vm7, %v2224_v4, %v2232_v2  ;;  %vm2266_vm7 = vcmask 785408  }
 0x3dd   : > { %2200 = vrot.lane.b32.xlu0 %v2197_v0, %s3028_s28  ;;  %v2973_v21 = vld [vmem:[#allocation4 + $0x10] ss:$0 sps:$4 sm:$0x11]  }
 0x3df   : > { %2176 = vrot.lane.b32.xlu1 %v2168_v45, %s3041_s22  ;;  %s400_s22 = scalar_lea.vmem %s3976_s11, %s2869_s19 }
 0x3e1   : > { %2234 = vrot.lane.b32.xlu0 %v2233_v13, %s3043_s30 }
 0x3e3   : > { %2202 = vrot.lane.b32.xlu1 %v2198_v22, %s3028_s28  ;;  %s2724_s28 = sld [smem:[#allocation6 + $0x2]] }
 0x3e5   : > { %2184 = vrot.lane.b32.xlu0 %v2963_v27, %s3038_s15 }
 0x3e7   : > { %2236 = vrot.lane.b32.xlu1 %v2228_v59, %s3043_s30 }
 0x3e9   : > { %2215 = vrot.lane.b32.xlu0 %v2211_v36, %s3042_s23  ;;  %v2414_v38 = vstv %s2724_s28 }
 0x441   : > { %v2183_v6 = vpop.permute.xlu1 %2182 }
 0x443   : > { %v2150_v7 = vpop.permute.xlu0 %2149 }
 0x445   : > { %v2137_v3 = vpop.permute.xlu1 %2136 }
 0x447   : > { %v2135_v8 = vpop.permute.xlu0 %2134 }
 0x448   : > { %v2244_v9 = vsel %vm2242_vm3, %v3858_v55, %v2135_v8  ;;  %v2246_v55 = vsel %vm2242_vm3, %v3879_v16, %v2137_v3 }
 0x449   : > { %v2148_v11 = vpop.permute.xlu1 %2147  ;;  %v2251_v24 = vsel %vm2247_vm0, %v2246_v55, %v2150_v7 }
 0x44a   : > { %v2249_v57 = vsel %vm2247_vm0, %v2244_v9, %v2148_v11 }
 0x44b   : > { %v2175_v15 = vpop.permute.xlu0 %2174 }
 0x44c   : > { %v2254_v26 = vsel %vm2252_vm1, %v2249_v57, %v2175_v15 }
 0x44d   : > { %v2214_v17 = vpop.permute.xlu1 %2213  ;;  %v2259_v19 = vsel %vm2257_vm2, %v2254_v26, %v2183_v6 }
 0x44f   : > { %v2201_v14 = vpop.permute.xlu0 %2200 }
 0x450   : > { %v2263_v34 = vsel %vm1926_vm5, %v2259_v19, %v2201_v14 }
 0x451   : > { %v2177_v30 = vpop.permute.xlu1 %2176  ;;  %v2268_v35 = vsel %vm2266_vm7, %v2263_v34, %v2214_v17  ;;  %v2560_v17 = vlaneseq  ;;  %v2530_v34 = vld [vmem:[%s3974_s9] sm:$0x1] }
 0x452   : > { %v2256_v10 = vsel %vm2252_vm1, %v2251_v24, %v2177_v30  ;;  %vm2531_vm10 = vcmp.gt.f32.partialorder %v2530_v34, 0.5 }
 0x453   : > { %v2235_v50 = vpop.permute.xlu0 %2234  ;;  %v2561_v55 = vshrl.u32 %v2560_v17, 7  ;;  %v2559_v24 = vsel %vm2531_vm10, 1, %v3037_v20 }
 0x454   : > { %v2273_v23 = vsel %vm2271_vm14, %v2268_v35, %v2235_v50 }
 0x455   : > { %2396 = vmatmul.mubr.bf16.vlgmr.msra.gmra.mrb[12].mxu1 %v2273_v23  ;;  %v2203_v45 = vpop.permute.xlu1 %2202 }
 0x456   : > { %2748 = vmatprep.mubr.msk.bf16.mxu1 %vm2242_vm3, %v2973_v21  ;;  %v2562_v21 = vsub.s32 0, %v2561_v55 }
 0x457   : > { %v2185_v27 = vpop.permute.xlu0 %2184 }
 0x458   : > { %v2261_v28 = vsel %vm2257_vm2, %v2256_v10, %v2185_v27 }
 0x459   : > { %v2265_v25 = vsel %vm1926_vm5, %v2261_v28, %v2203_v45  ;;  %v2237_v29 = vpop.permute.xlu1 %2236  ;;  %vm2434_vm5 = vcmask 257024   ;;  %v2563_v45 = vrot.slane %v2559_v24, %v2562_v21 }
 0x45b   : > { %v2216_v16 = vpop.permute.xlu0 %2215  ;;  %vm2564_vm3 = vcmp.eq.s32.totalorder %v2563_v45, 1 }
 0x45c   : > { %v2270_v49 = vsel %vm2266_vm7, %v2265_v25, %v2216_v16 }
 0x45d   : > { %v2276_v32 = vsel %vm2271_vm14, %v2270_v49, %v2237_v29 }
 0x45e   : > { %2404 = vmatmul.mubr.bf16.gmra.mrb[16].mxu1 %v2276_v32 }
 0x528   : > { %v2397_v31 = vpop.f32.mrb[12].mxu1 }
 0x529   : > { %v2398_v40 = vadd.f32 %v2737_v33, %v2397_v31  ;;  %v2399_v5 = vpop.f32.mrb[13].mxu1 }
 0x52a   : > { %v2400_v41 = vpop.f32.mrb[14].mxu1 }
 0x52b   : > { %vm2411_vm6 = vcmp.ge.f32.partialorder %v2398_v40, 0.0  ;;  %v2415_v42 = vmul.f32 %v2414_v38, %v2398_v40  ;;  %v2401_v43 = vadd.f32 %v2737_v33, %v2400_v41  ;;  %v2402_v44 = vpop.f32.mrb[15].mxu1 }
 0x52d   : > { %v2418_v36 = vsel %vm2411_vm6, %v2398_v40, %v2415_v42  ;;  %vm2412_vm9 = vcmp.ge.f32.partialorder %v2401_v43, 0.0  ;;  %v2416_v18 = vmul.f32 %v2414_v38, %v2401_v43 }
 0x52e   : > { %v2773_v46 = vpack.c.bf16 %v2418_v36, %v2418_v36 }
 0x52f   : > { %v2419_v47 = vsel %vm2412_vm9, %v2401_v43, %v2416_v18 }
 0x530   : > { %2435 = vst.msk [vmem:[#allocation5] sm:$0xf] %vm2434_vm5, %v2773_v46  ;;  %v2774_v51 = vpack.c.bf16 %v2419_v47, %v2419_v47 }
 0x531   : > { %v2405_v52 = vpop.f32.mrb[16].mxu1 }
 0x532   : > { %2436 = vst.msk [vmem:[#allocation5 + $0x4] sm:$0xf] %vm2434_vm5, %v2774_v51  ;;  %v2406_v54 = vadd.f32 %v2737_v33, %v2405_v52  ;;  %v2407_v63 = vpop.f32.mrb[17].mxu1 }
 0x533   : > { %v2408_v1 = vpop.f32.mrb[18].mxu1 }
 0x534   : > { %vm2413_vm15 = vcmp.ge.f32.partialorder %v2406_v54, 0.0  ;;  %v2417_v56 = vmul.f32 %v2414_v38, %v2406_v54  ;;  %v2409_v58 = vpop.f32.mrb[19].mxu1 }
 0x536   : > { %v2420_v37 = vsel %vm2413_vm15, %v2406_v54, %v2417_v56 }
 0x537   : > { %v2775_v59 = vpack.c.bf16 %v2420_v37, %v2420_v37 }
 0x539   : > { %v2440_v60 = vsel %vm2438_vm13, %v2775_v59, %v2439_v53  ;;  %v2976_v12 = vld [vmem:[#allocation5] sm:$0xff]  }
 0x53a   : > { %2441 = vst [vmem:[#allocation5 + $0x8] sm:$0x1] %v2440_v60  ;;  %2865 = vmatprep.mubr.msk.bf16.mxu0 %vm2247_vm0, %v2976_v12 }
 0x541   : > { %v2977_v62 = vld [vmem:[#allocation5 + $0x8] ss:$0 sps:$4 sm:$0x11]  }
 0x542   : > { %2866 = vmatmul.mubr.msk.bf16.vlgmr.msra.gmra.mrb[28].mxu0 %vm2247_vm0, %v2977_v62 }
 0x615   : > { %v2867_v0 = vpop.f32.mrb[28].mxu0 }
 0x616   : > { %v2525_v2 = vadd.f32 %v2867_v0, %v2752_v61  ;;  %v2516_v4 = vpop.f32.mrb[29].mxu0 }
 0x617   : > { %v2517_v39 = vadd.f32 %v2752_v61, %v2516_v4  ;;  %v2868_v48 = vpop.f32.mrb[30].mxu0 }
 0x618   : > { %v2534_v13 = vand.u32 2147483647, %v2525_v2  ;;  %v2519_v22 = vpop.f32.mrb[31].mxu0  ;;  %vm2552_vm4 = vcmp.ge.f32.partialorder %v2525_v2, 0.0 }
 0x619   : > { %v2532_v6 = vand.u32 2147483647, %v2517_v39  ;;  %v2520_v7 = vadd.f32 %v2752_v61, %v2519_v22  ;;  %vm2550_vm0 = vcmp.ge.f32.partialorder %v2517_v39, 0.0 }
 0x61a   : > { %v2537_v3 = vsub.f32 0.0, %v2534_v13 }
 0x61b   : > { %v2535_v8 = vsub.f32 0.0, %v2532_v6  ;;  %v2533_v9 = vand.u32 2147483647, %v2520_v7  ;;  %vm2551_vm1 = vcmp.ge.f32.partialorder %v2520_v7, 0.0 }
 0x61c   : > { %v2542_v11 = vmul.f32 1.442695, %v2537_v3 }
 0x61d   : > { %v2538_v57 = vmul.f32 1.442695, %v2535_v8  ;;  %v2536_v15 = vsub.f32 0.0, %v2533_v9 }
 0x61e   : > { %2978 = vpow2.f32 %v2542_v11 }
 0x61f   : > { %2980 = vpow2.f32 %v2538_v57  ;;  %v2540_v26 = vmul.f32 1.442695, %v2536_v15 }
 0x621   : > { %2982 = vpow2.f32 %v2540_v26 }
 0x628   : > { %v2979_v19 = vpop.eup %2978 }
 0x629   : > { %v2981_v14 = vpop.eup %2980  ;;  %v2546_v30 = vadd.f32 1.0, %v2979_v19 }
 0x62a   : > { %v2544_v35 = vadd.f32 1.0, %v2981_v14 }
 0x62b   : > { %v2983_v50 = vpop.eup %2982  ;;  %2984 = vrcp.f32 %v2546_v30 }
 0x62c   : > { %2986 = vrcp.f32 %v2544_v35  ;;  %v2545_v23 = vadd.f32 1.0, %v2983_v50 }
 0x62e   : > { %2988 = vrcp.f32 %v2545_v23 }
 0x635   : > { %v2985_v10 = vpop.eup %2984 }
 0x636   : > { %v2987_v27 = vpop.eup %2986  ;;  %v2555_v28 = vmul.f32 %v2985_v10, %v2979_v19 }
 0x637   : > { %v2553_v25 = vmul.f32 %v2987_v27, %v2981_v14 }
 0x638   : > { %v2989_v16 = vpop.eup %2988  ;;  %v2558_v29 = vsel %vm2552_vm4, %v2985_v10, %v2555_v28 }
 0x639   : > { %v2567_v49 = vsel %vm2564_vm3, %v2558_v29, %v2525_v2  ;;  %v2556_v32 = vsel %vm2550_vm0, %v2987_v27, %v2553_v25  ;;  %v2554_v20 = vmul.f32 %v2989_v16, %v2983_v50 }
 0x63a   : > { %2571 = vst.msk [vmem:[%s400_s22 + $0x10] sm:$0x1] %vm2570_vm11, %v2567_v49  ;;  %v2565_v33 = vsel %vm2564_vm3, %v2556_v32, %v2517_v39 }
 0x63b   : > { %2568 = vst.msk [vmem:[%s400_s22] sm:$0xff] %vm1044_vm8, %v2565_v33  ;;  %v2557_v31 = vsel %vm2551_vm1, %v2989_v16, %v2554_v20 }
 0x63c   : > { %v2566_v38 = vsel %vm2564_vm3, %v2557_v31, %v2520_v7 }
 0x63d   : > { %2569 = vst.msk [vmem:[%s400_s22 + $0x8] sm:$0xff] %vm1044_vm8, %v2566_v38 }
 0x63e PF: > { %s22_s17 = sadd.s32 1, %s3015_s17  }
 0x63f   : > { %p19_p1 = scmp.ge.s32.totalorder %s22_s17, 4  }
 0x641   :  { %21 = sbr.rel (!%p19_p1) target bundleno = 1 (0x1), region = 126 }
 0x648   :  { %2593 = vsyncpa [#allocation7], 1 }
 0x649   :  { %2595 = vsyncpa [#allocation7 + $0x1], 1 }

</bundles_post_ra>
